<compile_context>
chip_gen: v6e
topology: v6e:2x2x1
jax: 0.10.0
libtpu: 0.0.40
codegen_flags: <defaults>
</compile_context>

<pallas_src>
import jax
import jax.numpy as jnp
from jax.experimental import pallas as pl
from jax.experimental.pallas import tpu as pltpu


# ------------------------------- kernel ------------------------------------ #

def gcn_kernel(si_m_ref, si_c_ref, sj_m_ref, sj_c_ref, bbf_ref, mask_ref,
               wbm_ref, wbc_ref, wlogit_ref, wc2_ref, bc2_ref, out_ref):
    TI = si_m_ref.shape[0]            # query-object tile (i axis)
    N = sj_m_ref.shape[0]             # all objects (j axis, resident)
    H = sj_m_ref.shape[1]             # hidden_dim

    # ---- mlp branch: pre-activation of concat(f_i, f_j, bbox) @ W1_mlp + b ----
    # (i / j contributions were hoisted to the wrapper; only the bbox matmul here)
    sb_m = jnp.dot(bbf_ref[...], wbm_ref[...],
                   preferred_element_type=jnp.float32)                # [TI*N, H]
    pre_m = (sb_m.reshape(TI, N, H)
             + si_m_ref[...][:, None, :]
             + sj_m_ref[...][None, :, :])                             # [TI, N, H]
    act_m = jnp.where(pre_m >= 0.0, pre_m, 0.01 * pre_m)              # LeakyReLU(0.01)

    # ---- weight_mlp second layer (out_dim=1; eval-BN folded into wlogit; the
    #      additive constant is (i,j)-independent and cancels under softmax) ----
    logits = jnp.sum(act_m * wlogit_ref[...][None], axis=-1)          # [TI, N]

    # ---- softmax over j, mask, renormalize (EUP reciprocal + 1 Newton step) ----
    m = jnp.max(logits, axis=1, keepdims=True)
    e = jnp.exp(logits - m)
    den = jnp.sum(e, axis=1, keepdims=True)
    inv = pl.reciprocal(den, approx=True)
    inv = inv * (2.0 - den * inv)                                     # refine to ~f32
    conf = (e * inv) * mask_ref[...]
    den2 = jnp.sum(conf, axis=1, keepdims=True) + 1e-8
    inv2 = pl.reciprocal(den2, approx=True)
    inv2 = inv2 * (2.0 - den2 * inv2)
    conf = conf * inv2                                                # [TI, N]
    csum = jnp.sum(conf, axis=1, keepdims=True)                       # [TI, 1]

    # ---- conv branch (computed after softmax so mlp intermediates are dead) ----
    sb_c = jnp.dot(bbf_ref[...], wbc_ref[...],
                   preferred_element_type=jnp.float32)                # [TI*N, H]
    pre_c = (sb_c.reshape(TI, N, H)
             + si_c_ref[...][:, None, :]
             + sj_c_ref[...][None, :, :])                             # [TI, N, H]
    act_c = jnp.maximum(pre_c, 0.0)                                   # ReLU

    # conf-weighted aggregation BEFORE the second conv linear (linear in g)
    agg = jnp.sum(conf[:, :, None] * act_c, axis=1)                   # [TI, H]
    out_ref[...] = (jnp.dot(agg, wc2_ref[...], preferred_element_type=jnp.float32)
                    + csum * bc2_ref[...])                            # [TI, F]


# ---------------------------- tiling heuristics ----------------------------- #

def _vmem_bytes(ti, N, B, H, F, nbuf_bbf):
    """Rough per-step VMEM footprint (bytes) for the chosen i-tile."""
    pair = ti * N * H * 4                       # one [TI,N,H] f32 tensor
    live = 3 * pair                             # peak live intermediates per branch
    bbf = nbuf_bbf * ti * N * B * 2             # pipelined bf16 bbox-pair tiles
    resident = 2 * N * H * 4 + 2 * B * H * 2 + H * 4 + H * F * 4 + F * 4
    tiles = 2 * (2 * ti * H * 4 + ti * N * 4 + ti * F * 4)   # double-buffered small tiles
    return live + bbf + resident + tiles


def _choose_ti(N, B, H, F, budget, min_steps=2):
    """Largest i-tile (multiple of 8, divisor of N) under the VMEM budget,
    preferring >= min_steps grid steps so pipelining / megacore have work."""
    fitting = [t for t in range(8, N + 1, 8)
               if N % t == 0
               and _vmem_bytes(t, N, B, H, F, 3 if N // t >= 3 else 2) <= budget]
    if not fitting:
        return 8 if N % 8 == 0 else N
    preferred = [t for t in fitting if N // t >= min_steps]
    return max(preferred) if preferred else max(fitting)


# ------------------------------- wrapper ------------------------------------ #

def position_relation_encode_gcn(obj_feats, bboxes_embedding, mask, params, *,
                                 ti=None, vmem_budget_bytes=40 * 1024 * 1024):
    """obj_feats [N,F] f32, bboxes_embedding [N,N,B] f32, mask [N,N]."""
    N, F = obj_feats.shape
    B = bboxes_embedding.shape[-1]
    H = params["wb_m"].shape[1]

    mxu = jnp.bfloat16
    obj_b = obj_feats.astype(mxu)

    # Grid-invariant first-layer matmuls hoisted out of the kernel (plain XLA).
    # bf16 operands / f32 accumulation matches the in-kernel MXU dtype policy.
    si_m = jnp.dot(obj_b, params["wi_m"], preferred_element_type=jnp.float32) + params["b_m"]
    si_c = jnp.dot(obj_b, params["wi_c"], preferred_element_type=jnp.float32) + params["b_c"]
    sj_m = jnp.dot(obj_b, params["wj_m"], preferred_element_type=jnp.float32)
    sj_c = jnp.dot(obj_b, params["wj_c"], preferred_element_type=jnp.float32)

    # host-side reshape [N,N,B] -> [N*N,B] is layout-free; gives 2D MXU operand tiles
    bbf = bboxes_embedding.reshape(N * N, B).astype(mxu)
    mask = mask.astype(jnp.float32)

    if ti is None:
        ti = _choose_ti(N, B, H, F, vmem_budget_bytes)
    assert N % ti == 0, "pad N to a multiple of the i-tile (mask padded cols with 0)"
    n_steps = N // ti

    est = _vmem_bytes(ti, N, B, H, F, 3 if n_steps >= 3 else 2)
    vmem_limit = int(min(48 * 1024 * 1024, max(32 * 1024 * 1024, 2 * est)))

    def full(arr):                      # whole-array resident block
        nd = arr.ndim
        return pl.BlockSpec(arr.shape, lambda i, _nd=nd: (0,) * _nd)

    # Deeper buffering on the dominant bbox-pair stream once the grid is deep
    # enough to overlap (essential on v5e's lower HBM bandwidth at large N).
    bbf_kwargs = {}
    if n_steps >= 3:
        bbf_kwargs["pipeline_mode"] = pl.Buffered(3)
    bbf_spec = pl.BlockSpec((ti * N, B), lambda i: (i, 0), **bbf_kwargs)

    return pl.pallas_call(
        gcn_kernel,
        out_shape=jax.ShapeDtypeStruct((N, F), jnp.float32),
        grid=(n_steps,),
        in_specs=[
            pl.BlockSpec((ti, H), lambda i: (i, 0)),    # si_m (hoisted, i-tiled)
            pl.BlockSpec((ti, H), lambda i: (i, 0)),    # si_c
            full(sj_m),                                 # sj_m (resident)
            full(sj_c),                                 # sj_c
            bbf_spec,                                   # bbox-pair embeddings (i-tiled)
            pl.BlockSpec((ti, N), lambda i: (i, 0)),    # mask rows
            full(params["wb_m"]),
            full(params["wb_c"]),
            full(params["w_logit"]),
            full(params["wc2"]),
            full(params["bc2"]),
        ],
        out_specs=pl.BlockSpec((ti, F), lambda i: (i, 0)),
        compiler_params=pltpu.CompilerParams(
            dimension_semantics=("parallel",),          # shard i-rows across TCs
            vmem_limit_bytes=vmem_limit),
    )(si_m, si_c, sj_m, sj_c, bbf, mask,
      params["wb_m"], params["wb_c"], params["w_logit"], params["wc2"], params["bc2"])


# ----------------------------- parameters ----------------------------------- #

def make_raw_params(key, feat_dim, hidden_dim, box_emb_dim):
    """PyTorch-style params: Linear weights stored [in, out]; eval BN stats."""
    D = 2 * feat_dim + box_emb_dim
    ks = jax.random.split(key, 12)

    def uniform(k, bound, shape):
        return jax.random.uniform(k, shape, jnp.float32, -bound, bound)

    def kaiming(k, fan_in, shape):
        return jax.random.normal(k, shape, jnp.float32) * jnp.sqrt(2.0 / fan_in)

    lb_D = 1.0 / jnp.sqrt(D)
    lb_H = 1.0 / jnp.sqrt(hidden_dim)
    return dict(
        # weight_mlp: Linear(D,H) -> LeakyReLU -> BatchNorm1d -> Dropout(eval) -> Linear(H,1)
        wm1=uniform(ks[0], lb_D, (D, hidden_dim)),
        bm1=uniform(ks[1], lb_D, (1, hidden_dim)),
        wm2=uniform(ks[2], lb_H, (1, hidden_dim)),
        bm2=uniform(ks[3], lb_H, (1, 1)),
        bn_gamma=jax.random.uniform(ks[4], (hidden_dim,), jnp.float32, 0.5, 1.5),
        bn_beta=0.1 * jax.random.normal(ks[5], (hidden_dim,), jnp.float32),
        bn_mean=0.1 * jax.random.normal(ks[6], (hidden_dim,), jnp.float32),
        bn_var=jax.random.uniform(ks[7], (hidden_dim,), jnp.float32, 0.5, 1.5),
        # conv: Linear(D,H) (kaiming weight) -> ReLU -> Linear(H,F)
        wc1=kaiming(ks[8], D, (D, hidden_dim)),
        bc1=uniform(ks[9], lb_D, (1, hidden_dim)),
        wc2=kaiming(ks[10], hidden_dim, (hidden_dim, feat_dim)),
        bc2=uniform(ks[11], lb_H, (1, feat_dim)),
    )


def prepare_params(raw, feat_dim):
    """Host-side: split W1 over the concat blocks (feat_i | feat_j | bbox) for both
    branches, fold eval-BN into the logit weights (additive const cancels under
    softmax-over-j), and cast the MXU operands to bf16."""
    F = feat_dim
    mxu = jnp.bfloat16
    scale = raw["bn_gamma"] / jnp.sqrt(raw["bn_var"] + 1e-5)
    return dict(
        # mlp branch first layer, block-decomposed
        wi_m=raw["wm1"][:F].astype(mxu),            # [F, H]
        wj_m=raw["wm1"][F:2 * F].astype(mxu),       # [F, H]
        wb_m=raw["wm1"][2 * F:].astype(mxu),        # [B, H]
        b_m=raw["bm1"],                             # [1, H]
        # conv branch first layer, block-decomposed
        wi_c=raw["wc1"][:F].astype(mxu),
        wj_c=raw["wc1"][F:2 * F].astype(mxu),
        wb_c=raw["wc1"][2 * F:].astype(mxu),
        b_c=raw["bc1"],
        # BN-folded logit weights (bm2 + BN shift are j-independent -> dropped)
        w_logit=(raw["wm2"][0] * scale)[None],      # [1, H]
        wc2=raw["wc2"],                             # [H, F]
        bc2=raw["bc2"],                             # [1, F]
    )


# ------------------------------ reference ------------------------------------ #

def reference_forward(obj, bbox, mask, raw):
    """Pure-JAX mirror of the PyTorch forward (eval BN / dropout).  First-layer
    matmuls use bf16 operands with f32 accumulation, matching the kernel's MXU
    dtype policy, so the check isolates the algebraic restructuring."""
    N, F = obj.shape
    fi = jnp.broadcast_to(obj[:, None, :], (N, N, F))
    fj = jnp.broadcast_to(obj[None, :, :], (N, N, F))
    feats = jnp.concatenate([fi, fj, bbox], axis=-1).reshape(N * N, -1)
    fb = feats.astype(jnp.bfloat16)

    # weight_mlp
    h = jnp.dot(fb, raw["wm1"].astype(jnp.bfloat16),
                preferred_element_type=jnp.float32) + raw["bm1"]
    h = jnp.where(h >= 0, h, 0.01 * h)                              # LeakyReLU
    scale = raw["bn_gamma"] / jnp.sqrt(raw["bn_var"] + 1e-5)
    h = (h - raw["bn_mean"]) * scale + raw["bn_beta"]               # eval BatchNorm1d
    logits = (jnp.dot(h, raw["wm2"].T, precision="highest")
              + raw["bm2"]).reshape(N, N)                           # Dropout -> identity
    conf = jax.nn.softmax(logits, axis=1) * mask
    conf = conf / (conf.sum(1, keepdims=True) + 1e-8)

    # conv
    g = jnp.maximum(jnp.dot(fb, raw["wc1"].astype(jnp.bfloat16),
                            preferred_element_type=jnp.float32) + raw["bc1"], 0.0)
    f2 = (jnp.dot(g, raw["wc2"], precision="highest") + raw["bc2"]).reshape(N, N, F)
    return jnp.sum(conf[:, :, None] * f2, axis=1)


if __name__ == "__main__":
    # small shapes consistent with the module (feat_dim = hidden_dim = box_emb_dim);
    # N=16 with auto-chosen TI=8 exercises the i-grid (grid=(2,)).
    N, feat_dim, hidden_dim, box_emb_dim = 16, 32, 32, 32
    key = jax.random.PRNGKey(0)
    k_obj, k_box, k_mask, k_par = jax.random.split(key, 4)

    obj_feats = jax.random.normal(k_obj, (N, feat_dim), jnp.float32)
    bboxes_embedding = jax.random.normal(k_box, (N, N, box_emb_dim), jnp.float32)
    mask = (jax.random.uniform(k_mask, (N, N)) > 0.3).astype(jnp.float32)

    raw = make_raw_params(k_par, feat_dim, hidden_dim, box_emb_dim)
    params = prepare_params(raw, feat_dim)

    out = position_relation_encode_gcn(obj_feats, bboxes_embedding, mask, params)
    out = jax.block_until_ready(out)

    ref = reference_forward(obj_feats, bboxes_embedding, mask, raw)
    err = float(jnp.max(jnp.abs(out - ref)))
    assert out.shape == (N, feat_dim) and err < 2e-3, f"mismatch: {err}"
    print("KERNEL_OK")
</pallas_src>

<mosaic_0001>
module attributes {stable_mosaic.version = 11 : i64} {
  func.func @gcn_kernel(%arg0: i32, %arg1: memref<8x32xf32, #tpu.memory_space<vmem>>, %arg2: memref<8x32xf32, #tpu.memory_space<vmem>>, %arg3: memref<16x32xf32, #tpu.memory_space<vmem>>, %arg4: memref<16x32xf32, #tpu.memory_space<vmem>>, %arg5: memref<128x32xbf16, #tpu.memory_space<vmem>>, %arg6: memref<8x16xf32, #tpu.memory_space<vmem>>, %arg7: memref<32x32xbf16, #tpu.memory_space<vmem>>, %arg8: memref<32x32xbf16, #tpu.memory_space<vmem>>, %arg9: memref<1x32xf32, #tpu.memory_space<vmem>>, %arg10: memref<32x32xf32, #tpu.memory_space<vmem>>, %arg11: memref<1x32xf32, #tpu.memory_space<vmem>>, %arg12: memref<8x32xf32, #tpu.memory_space<vmem>>) attributes {dimension_semantics = [#tpu.dimension_semantics<parallel>], iteration_bounds = array<i64: 2>, scalar_prefetch = 0 : i64, scratch_operands = 0 : i64, tpu.core_type = #tpu.core_type<tc>, window_params = [{transform_indices = @transform_0, window_bounds = array<i64: 8, 32>}, {transform_indices = @transform_1, window_bounds = array<i64: 8, 32>}, {pipeline_mode = #tpu.pipeline_mode<synchronous>, transform_indices = @transform_2, window_bounds = array<i64: 16, 32>}, {pipeline_mode = #tpu.pipeline_mode<synchronous>, transform_indices = @transform_3, window_bounds = array<i64: 16, 32>}, {transform_indices = @transform_4, window_bounds = array<i64: 128, 32>}, {transform_indices = @transform_5, window_bounds = array<i64: 8, 16>}, {pipeline_mode = #tpu.pipeline_mode<synchronous>, transform_indices = @transform_6, window_bounds = array<i64: 32, 32>}, {pipeline_mode = #tpu.pipeline_mode<synchronous>, transform_indices = @transform_7, window_bounds = array<i64: 32, 32>}, {pipeline_mode = #tpu.pipeline_mode<synchronous>, transform_indices = @transform_8, window_bounds = array<i64: 1, 32>}, {pipeline_mode = #tpu.pipeline_mode<synchronous>, transform_indices = @transform_9, window_bounds = array<i64: 32, 32>}, {pipeline_mode = #tpu.pipeline_mode<synchronous>, transform_indices = @transform_10, window_bounds = array<i64: 1, 32>}, {transform_indices = @transform_11, window_bounds = array<i64: 8, 32>}]} {
    %c0 = arith.constant 0 : index
    %c0_0 = arith.constant 0 : index
    %0 = vector.load %arg5[%c0, %c0_0] : memref<128x32xbf16, #tpu.memory_space<vmem>>, vector<128x32xbf16>
    %c0_1 = arith.constant 0 : index
    %c0_2 = arith.constant 0 : index
    %1 = vector.load %arg7[%c0_1, %c0_2] : memref<32x32xbf16, #tpu.memory_space<vmem>>, vector<32x32xbf16>
    %cst = arith.constant dense<0.000000e+00> : vector<128x32xf32>
    %2 = tpu.matmul %0, %1, %cst {dimension_numbers = #tpu.dot_dimension_numbers<[1], [0], [0], [1], [0, 0, 1, 1], [], []>} : vector<128x32xbf16>, vector<32x32xbf16>, vector<128x32xf32> -> vector<128x32xf32>
    %3 = vector.shape_cast %2 : vector<128x32xf32> to vector<8x16x32xf32>
    %c0_3 = arith.constant 0 : index
    %c0_4 = arith.constant 0 : index
    %4 = vector.load %arg1[%c0_3, %c0_4] : memref<8x32xf32, #tpu.memory_space<vmem>>, vector<8x32xf32>
    %5 = vector.shape_cast %4 : vector<8x32xf32> to vector<8x1x32xf32>
    %6 = vector.broadcast %5 : vector<8x1x32xf32> to vector<8x16x32xf32>
    %7 = arith.addf %3, %6 : vector<8x16x32xf32>
    %c0_5 = arith.constant 0 : index
    %c0_6 = arith.constant 0 : index
    %8 = vector.load %arg3[%c0_5, %c0_6] : memref<16x32xf32, #tpu.memory_space<vmem>>, vector<16x32xf32>
    %9 = vector.shape_cast %8 : vector<16x32xf32> to vector<1x16x32xf32>
    %10 = vector.broadcast %9 : vector<1x16x32xf32> to vector<8x16x32xf32>
    %11 = arith.addf %7, %10 : vector<8x16x32xf32>
    %cst_7 = arith.constant 0.000000e+00 : f32
    %12 = vector.broadcast %cst_7 : f32 to vector<8x16x32xf32>
    %13 = arith.cmpf oge, %11, %12 : vector<8x16x32xf32>
    %cst_8 = arith.constant 0.00999999977 : f32
    %14 = vector.broadcast %cst_8 : f32 to vector<8x16x32xf32>
    %15 = arith.mulf %14, %11 : vector<8x16x32xf32>
    %16 = arith.select %13, %11, %15 : vector<8x16x32xi1>, vector<8x16x32xf32>
    %c0_9 = arith.constant 0 : index
    %c0_10 = arith.constant 0 : index
    %17 = vector.load %arg9[%c0_9, %c0_10] : memref<1x32xf32, #tpu.memory_space<vmem>>, vector<1x32xf32>
    %18 = vector.shape_cast %17 : vector<1x32xf32> to vector<1x1x32xf32>
    %19 = vector.broadcast %18 : vector<1x1x32xf32> to vector<8x16x32xf32>
    %20 = arith.mulf %16, %19 : vector<8x16x32xf32>
    %cst_11 = arith.constant dense<0.000000e+00> : vector<8x16xf32>
    %21 = vector.multi_reduction <add>, %20, %cst_11 [2] : vector<8x16x32xf32> to vector<8x16xf32>
    %cst_12 = arith.constant dense<0xFF800000> : vector<8xf32>
    %22 = vector.multi_reduction <maximumf>, %21, %cst_12 [1] : vector<8x16xf32> to vector<8xf32>
    %23 = vector.shape_cast %22 : vector<8xf32> to vector<8x1xf32>
    %24 = vector.broadcast %23 : vector<8x1xf32> to vector<8x16xf32>
    %25 = arith.subf %21, %24 : vector<8x16xf32>
    %26 = math.exp %25 : vector<8x16xf32>
    %cst_13 = arith.constant dense<0.000000e+00> : vector<8xf32>
    %27 = vector.multi_reduction <add>, %26, %cst_13 [1] : vector<8x16xf32> to vector<8xf32>
    %28 = vector.shape_cast %27 : vector<8xf32> to vector<8x1xf32>
    %29 = tpu.reciprocal %28 {approx = true} : vector<8x1xf32> -> vector<8x1xf32>
    %30 = arith.mulf %28, %29 : vector<8x1xf32>
    %cst_14 = arith.constant 2.000000e+00 : f32
    %31 = vector.broadcast %cst_14 : f32 to vector<8x1xf32>
    %32 = arith.subf %31, %30 : vector<8x1xf32>
    %33 = arith.mulf %29, %32 : vector<8x1xf32>
    %34 = vector.broadcast %33 : vector<8x1xf32> to vector<8x16xf32>
    %35 = arith.mulf %26, %34 : vector<8x16xf32>
    %c0_15 = arith.constant 0 : index
    %c0_16 = arith.constant 0 : index
    %36 = vector.load %arg6[%c0_15, %c0_16] : memref<8x16xf32, #tpu.memory_space<vmem>>, vector<8x16xf32>
    %37 = arith.mulf %35, %36 : vector<8x16xf32>
    %cst_17 = arith.constant dense<0.000000e+00> : vector<8xf32>
    %38 = vector.multi_reduction <add>, %37, %cst_17 [1] : vector<8x16xf32> to vector<8xf32>
    %39 = vector.shape_cast %38 : vector<8xf32> to vector<8x1xf32>
    %cst_18 = arith.constant 9.99999993E-9 : f32
    %40 = vector.broadcast %cst_18 : f32 to vector<8x1xf32>
    %41 = arith.addf %39, %40 : vector<8x1xf32>
    %42 = tpu.reciprocal %41 {approx = true} : vector<8x1xf32> -> vector<8x1xf32>
    %43 = arith.mulf %41, %42 : vector<8x1xf32>
    %cst_19 = arith.constant 2.000000e+00 : f32
    %44 = vector.broadcast %cst_19 : f32 to vector<8x1xf32>
    %45 = arith.subf %44, %43 : vector<8x1xf32>
    %46 = arith.mulf %42, %45 : vector<8x1xf32>
    %47 = vector.broadcast %46 : vector<8x1xf32> to vector<8x16xf32>
    %48 = arith.mulf %37, %47 : vector<8x16xf32>
    %cst_20 = arith.constant dense<0.000000e+00> : vector<8xf32>
    %49 = vector.multi_reduction <add>, %48, %cst_20 [1] : vector<8x16xf32> to vector<8xf32>
    %50 = vector.shape_cast %49 : vector<8xf32> to vector<8x1xf32>
    %c0_21 = arith.constant 0 : index
    %c0_22 = arith.constant 0 : index
    %51 = vector.load %arg5[%c0_21, %c0_22] : memref<128x32xbf16, #tpu.memory_space<vmem>>, vector<128x32xbf16>
    %c0_23 = arith.constant 0 : index
    %c0_24 = arith.constant 0 : index
    %52 = vector.load %arg8[%c0_23, %c0_24] : memref<32x32xbf16, #tpu.memory_space<vmem>>, vector<32x32xbf16>
    %cst_25 = arith.constant dense<0.000000e+00> : vector<128x32xf32>
    %53 = tpu.matmul %51, %52, %cst_25 {dimension_numbers = #tpu.dot_dimension_numbers<[1], [0], [0], [1], [0, 0, 1, 1], [], []>} : vector<128x32xbf16>, vector<32x32xbf16>, vector<128x32xf32> -> vector<128x32xf32>
    %54 = vector.shape_cast %53 : vector<128x32xf32> to vector<8x16x32xf32>
    %c0_26 = arith.constant 0 : index
    %c0_27 = arith.constant 0 : index
    %55 = vector.load %arg2[%c0_26, %c0_27] : memref<8x32xf32, #tpu.memory_space<vmem>>, vector<8x32xf32>
    %56 = vector.shape_cast %55 : vector<8x32xf32> to vector<8x1x32xf32>
    %57 = vector.broadcast %56 : vector<8x1x32xf32> to vector<8x16x32xf32>
    %58 = arith.addf %54, %57 : vector<8x16x32xf32>
    %c0_28 = arith.constant 0 : index
    %c0_29 = arith.constant 0 : index
    %59 = vector.load %arg4[%c0_28, %c0_29] : memref<16x32xf32, #tpu.memory_space<vmem>>, vector<16x32xf32>
    %60 = vector.shape_cast %59 : vector<16x32xf32> to vector<1x16x32xf32>
    %61 = vector.broadcast %60 : vector<1x16x32xf32> to vector<8x16x32xf32>
    %62 = arith.addf %58, %61 : vector<8x16x32xf32>
    %cst_30 = arith.constant 0.000000e+00 : f32
    %63 = vector.broadcast %cst_30 : f32 to vector<8x16x32xf32>
    %64 = arith.maximumf %62, %63 : vector<8x16x32xf32>
    %65 = vector.shape_cast %48 : vector<8x16xf32> to vector<8x16x1xf32>
    %66 = vector.broadcast %65 : vector<8x16x1xf32> to vector<8x16x32xf32>
    %67 = arith.mulf %66, %64 : vector<8x16x32xf32>
    %cst_31 = arith.constant dense<0.000000e+00> : vector<8x32xf32>
    %68 = vector.multi_reduction <add>, %67, %cst_31 [1] : vector<8x16x32xf32> to vector<8x32xf32>
    %c0_32 = arith.constant 0 : index
    %c0_33 = arith.constant 0 : index
    %69 = vector.load %arg10[%c0_32, %c0_33] : memref<32x32xf32, #tpu.memory_space<vmem>>, vector<32x32xf32>
    %cst_34 = arith.constant dense<0.000000e+00> : vector<8x32xf32>
    %70 = tpu.matmul %68, %69, %cst_34 {dimension_numbers = #tpu.dot_dimension_numbers<[1], [0], [0], [1], [0, 0, 1, 1], [], []>} : vector<8x32xf32>, vector<32x32xf32>, vector<8x32xf32> -> vector<8x32xf32>
    %c0_35 = arith.constant 0 : index
    %c0_36 = arith.constant 0 : index
    %71 = vector.load %arg11[%c0_35, %c0_36] : memref<1x32xf32, #tpu.memory_space<vmem>>, vector<1x32xf32>
    %72 = vector.broadcast %50 : vector<8x1xf32> to vector<8x32xf32>
    %73 = vector.broadcast %71 : vector<1x32xf32> to vector<8x32xf32>
    %74 = arith.mulf %72, %73 : vector<8x32xf32>
    %75 = arith.addf %70, %74 : vector<8x32xf32>
    %c0_37 = arith.constant 0 : index
    %c0_38 = arith.constant 0 : index
    %76 = vector.load %arg12[%c0_37, %c0_38] : memref<8x32xf32, #tpu.memory_space<vmem>>, vector<8x32xf32>
    tpu.vector_store %arg12[%c0_37, %c0_38], %75 {strides = array<i32>} : memref<8x32xf32, #tpu.memory_space<vmem>>, vector<8x32xf32>,
    return
  }
  func.func @transform_0(%arg0: i32) -> (i32, i32) {
    %c0_i32 = arith.constant 0 : i32
    %c0_i32_0 = arith.constant 0 : i32
    return %arg0, %c0_i32 : i32, i32
  }
  func.func @transform_1(%arg0: i32) -> (i32, i32) {
    %c0_i32 = arith.constant 0 : i32
    %c0_i32_0 = arith.constant 0 : i32
    return %arg0, %c0_i32 : i32, i32
  }
  func.func @transform_2(%arg0: i32) -> (i32, i32) {
    %c0_i32 = arith.constant 0 : i32
    %c0_i32_0 = arith.constant 0 : i32
    %c0_i32_1 = arith.constant 0 : i32
    return %c0_i32, %c0_i32_0 : i32, i32
  }
  func.func @transform_3(%arg0: i32) -> (i32, i32) {
    %c0_i32 = arith.constant 0 : i32
    %c0_i32_0 = arith.constant 0 : i32
    %c0_i32_1 = arith.constant 0 : i32
    return %c0_i32, %c0_i32_0 : i32, i32
  }
  func.func @transform_4(%arg0: i32) -> (i32, i32) {
    %c0_i32 = arith.constant 0 : i32
    %c0_i32_0 = arith.constant 0 : i32
    return %arg0, %c0_i32 : i32, i32
  }
  func.func @transform_5(%arg0: i32) -> (i32, i32) {
    %c0_i32 = arith.constant 0 : i32
    %c0_i32_0 = arith.constant 0 : i32
    return %arg0, %c0_i32 : i32, i32
  }
  func.func @transform_6(%arg0: i32) -> (i32, i32) {
    %c0_i32 = arith.constant 0 : i32
    %c0_i32_0 = arith.constant 0 : i32
    %c0_i32_1 = arith.constant 0 : i32
    return %c0_i32, %c0_i32_0 : i32, i32
  }
  func.func @transform_7(%arg0: i32) -> (i32, i32) {
    %c0_i32 = arith.constant 0 : i32
    %c0_i32_0 = arith.constant 0 : i32
    %c0_i32_1 = arith.constant 0 : i32
    return %c0_i32, %c0_i32_0 : i32, i32
  }
  func.func @transform_8(%arg0: i32) -> (i32, i32) {
    %c0_i32 = arith.constant 0 : i32
    %c0_i32_0 = arith.constant 0 : i32
    %c0_i32_1 = arith.constant 0 : i32
    return %c0_i32, %c0_i32_0 : i32, i32
  }
  func.func @transform_9(%arg0: i32) -> (i32, i32) {
    %c0_i32 = arith.constant 0 : i32
    %c0_i32_0 = arith.constant 0 : i32
    %c0_i32_1 = arith.constant 0 : i32
    return %c0_i32, %c0_i32_0 : i32, i32
  }
  func.func @transform_10(%arg0: i32) -> (i32, i32) {
    %c0_i32 = arith.constant 0 : i32
    %c0_i32_0 = arith.constant 0 : i32
    %c0_i32_1 = arith.constant 0 : i32
    return %c0_i32, %c0_i32_0 : i32, i32
  }
  func.func @transform_11(%arg0: i32) -> (i32, i32) {
    %c0_i32 = arith.constant 0 : i32
    %c0_i32_0 = arith.constant 0 : i32
    return %arg0, %c0_i32 : i32, i32
  }
}

</mosaic_0001>

<bundles_post_ra>
// kernel: tpu_custom_call.1
= control target key start
LH: loop header
LB: loop body
LE: loop exit
PB: predicated region body
PF: predicated region fallthrough
CT: control target
= control target key end

     0   :  { %s3446_s0 = inlined_call_operand.vmem [shape: f32[16,32], index: 0, kind: input, shape index: {}]   ;;  %s3447_s1 = inlined_call_operand.vmem [shape: f32[16,32], index: 1, kind: input, shape index: {}]   ;;  %s3448_s2 = inlined_call_operand.vmem [shape: f32[16,32], index: 2, kind: input, shape index: {}]   ;;  %s3449_s3 = inlined_call_operand.vmem [shape: f32[16,32], index: 3, kind: input, shape index: {}]   ;;  %s3450_s4 = inlined_call_operand.vmem [shape: bf16[256,32], index: 4, kind: input, shape index: {}]   ;;  %s3451_s5 = inlined_call_operand.vmem [shape: f32[16,16], index: 5, kind: input, shape index: {}]   ;;  %s3452_s6 = inlined_call_operand.vmem [shape: bf16[32,32], index: 6, kind: input, shape index: {}]   ;;  %s3453_s7 = inlined_call_operand.vmem [shape: bf16[32,32], index: 7, kind: input, shape index: {}]   ;;  %s3454_s8 = inlined_call_operand.vmem [shape: f32[1,32], index: 8, kind: input, shape index: {}]   ;;  %s3455_s9 = inlined_call_operand.vmem [shape: f32[32,32], index: 9, kind: input, shape index: {}]   ;;  %s3456_s10 = inlined_call_operand.vmem [shape: f32[1,32], index: 10, kind: input, shape index: {}]   ;;  %s3457_s11 = inlined_call_operand.hbm [shape: f32[16,32], index: 11, kind: output, shape index: {}]  }
   0x1   :  { %3458 = sst [smem:[#allocation5_spill]] %s3446_s0 }
   0x2   :  { %16 = vsyncpa [#allocation3], 0 }
   0x3   :  { %18 = vsyncpa [#allocation3 + $0x1], 0  ;;  %s2677_s17 = smov 0   ;;  %s2679_s18 = smov 0  }
   0x4   :  { %s2681_s19 = smov 0   ;;  %s2683_s20 = smov 0  }
   0x5 LB: > { %s2698_s21 = sadd.s32 4294967295, %s2610_s20   ;;  %s2330_s22 = sadd.s32 4294967294, %s2610_s20   ;;  %s2610_s20 = sphi %s2683_s20, %s3465_s20   ;;  %s2606_s19 = sphi %s2681_s19, %s3464_s19   ;;  %s2602_s18 = sphi %s2679_s18, %s3463_s18   ;;  %s2598_s17 = sphi %s2677_s17, %s3462_s17  }
   0x6   : > { %s2702_s23 = sadd.s32 1, %s2610_s20   ;;  %s282_s24 = sadd.s32 1, %s2606_s19 }
   0x7   : > { %s279_s25 = ssub.s32 %s2610_s20, %s2702_s23  ;;  %p292_p0 = scmp.ne.s32.totalorder %s2606_s19, %s2602_s18 }
   0x8   : > { %p280_p1 = scmp.eq.s32.totalorder %s279_s25, 0  ;;  %p293_p2 = scmp.eq.s32.totalorder %s2698_s21, 1 }
   0x9   : > { %p298_p3 = scmp.ne.s32.totalorder %s2602_s18, %s2598_s17  ;;  %p299_p4 = scmp.eq.s32.totalorder %s2330_s22, 1 }
   0xa   : > { %s2713_s26 = scalar_select %p280_p1, %s2606_s19, %s282_s24  }
   0xb   : > { %p2715_p5 = por %p293_p2, %p292_p0  ;;  %p2719_p6 = por %p299_p4, %p298_p3 }
   0xc   : > { %p2333_p7 = scmp.ge.s32.totalorder %s2610_s20, 1  ;;  %p368_p8 = scmp.lt.s32.totalorder %s2610_s20, 3 }
   0xe   : > { %p369_p9 = pnand %p2333_p7, %p368_p8 }
   0xf   : > { %s2337_s12 = sshll.u32 (!%p369_p9), %s2698_s21, 4  ;;  %p420_p11 = scmp.lt.s32.totalorder (!%p369_p9), %s2698_s21, 1 }
  0x10   : > { %372 = sbr.rel (%p369_p9) target bundleno = 1628 (0x65c), region = 64  ;;  %p429_p10 = scmp.lt.s32.totalorder (!%p369_p9), %s2337_s12, 31 }
  0x11   : > { %s3461_s0 = sld [smem:[#allocation5_spill]] (!%p369_p9) }
  0x15   : > { %v2496_v0 = vld [vmem:[%s3452_s6 + $0x8] sm:$0xff]   ;;  %v2497_v1 = vld [vmem:[%s3452_s6] sm:$0xff]   ;;  %s3467_s12 = smov (!%p429_p10, %s2337_s12), 31  ;;  %vm511_vm0 = vcmask 261120   ;;  %v2612_v10 = vmov 1966171168   ;;  %v639_v12 = vlaneseq }
  0x16   : > { %2400 = vmatprep.subr.bf16.mxu0 %v2496_v0  ;;  %s2338_s15 = sshll.u32 %s3467_s12, 2  ;;  %v637_v11 = vunpack.c.l.s4 %v2612_v10  ;;  %v2789_v27 = vld [vmem:[%s3448_s2] sm:$0xff]  ;;  %v2795_v36 = vld [vmem:[%s3448_s2 + $0x8] sm:$0xff] }
  0x17   : > { %2401 = vmatpush3.bf16.msra.mxu0 %v2496_v0  ;;  %s2735_s24 = scalar_lea.vmem %s3450_s4, %s2338_s15  ;;  %v2768_v14 = vshrl.u32 %v639_v12, 7  ;;  %v2802_v41 = vld [vmem:[%s3454_s8] ss:$0 sm:$0xff]  ;;  %s417_s15 = sand.u32 1, %s2602_s18  }
  0x18   : > { %2402 = vmatprep.subr.bf16.mxu0 %v2497_v1  ;;  %v2498_v2 = vld [vmem:[%s2735_s24] sm:$0xff]   ;;  %v2499_v3 = vld [vmem:[%s2735_s24 + $0x8] sm:$0xff]   ;;  %v2500_v4 = vld [vmem:[%s2735_s24 + $0x10] sm:$0xff]   ;;  %s421_s25 = scalar_select %p420_p11, %s2698_s21, 1  ;;  %v638_v13 = vunpack.c.0.s8 %v637_v11 }
  0x19   : > { %2404 = vmatprep.mubr.msk.bf16.mxu0 %vm511_vm0, %v2498_v2  ;;  %2424 = vmatprep.mubr.msk.bf16.mxu1 %vm511_vm0, %v2498_v2  ;;  %v2501_v5 = vld [vmem:[%s2735_s24 + $0x18] sm:$0xff]   ;;  %v2502_v6 = vld [vmem:[%s2735_s24 + $0x20] sm:$0xff]   ;;  %v2749_v7 = vld [vmem:[%s2735_s24 + $0x28] sm:$0xff]   ;;  %v2780_v20 = vsub.s32 0, %v2768_v14  ;;  %s2334_s16 = sshll.u32 %s417_s15, 3 }
  0x1a   : > { %v2752_v8 = vld [vmem:[%s2735_s24 + $0x30] sm:$0xff]   ;;  %v2759_v9 = vld [vmem:[%s2735_s24 + $0x38] sm:$0xff]   ;;  %s2765_s29 = sshll.u32 %s421_s25, 3  ;;  %v2775_v15 = vsub.s32 %v638_v13, %v2768_v14 }
  0x1b   : > { %2403 = vmatpush3.bf16.msra.mxu0 %v2497_v1  ;;  %s423_s13 = scalar_lea.vmem %s3461_s0, %s2765_s29  ;;  %s437_s14 = scalar_lea.vmem %s3451_s5, %s2765_s29 }
  0x1c   : > { %v633_v16 = vld [vmem:[%s423_s13] sm:$0xff]  ;;  %s427_s30 = scalar_lea.vmem %s3447_s1, %s2765_s29  ;;  %s2222_s0 = scalar_lea.sflag [#allocation3], %s417_s15 }
  0x1d   : > { %v642_v17 = vrot.slane %v633_v16, %v2775_v15  ;;  %v635_v21 = vcombine.high %v633_v16, %v633_v16 }
  0x1e   : > { %2405 = vmatmul.mubr.msk.bf16.vlgmr.msra.gmra.mxu0 %vm511_vm0, %v2499_v3 }
  0x1f   : > { %2408 = vmatprep.mubr.msk.bf16.mxu0 %vm511_vm0, %v2500_v4  ;;  %v650_v18 = vcombine.high %v642_v17, %v642_v17  ;;  %v658_v22 = vrot.slane %v642_v17, %v2775_v15  ;;  %v649_v24 = vrot.slane %v635_v21, %v2775_v15 }
  0x21   : > { %v672_v19 = vrot.slane %v650_v18, %v2775_v15  ;;  %v687_v25 = vrot.slane %v658_v22, %v2780_v20  ;;  %v680_v31 = vcombine.high %v658_v22, %v658_v22  ;;  %v651_v32 = vcombine.high %v649_v24, %v649_v24 }
  0x22   : > { %v2809_v51 = vrot.slane %v649_v24, %v2775_v15 }
  0x23   : > { %v691_v23 = vrot.slane %v672_v19, %v2780_v20  ;;  %v682_v28 = vcombine.high %v672_v19, %v672_v19  ;;  %v695_v43 = vrot.slane %v680_v31, %v2780_v20  ;;  %v679_v44 = vrot.slane %v651_v32, %v2775_v15 }
  0x24   : > { %v703_v3 = vrot.slane %v2809_v51, %v2780_v20 }
  0x25   : > { %v699_v37 = vrot.slane %v682_v28, %v2780_v20  ;;  %v707_v59 = vrot.slane %v679_v44, %v2780_v20  ;;  %v683_v17 = vcombine.high %v679_v44, %v679_v44 }
  0x26   : > { %2409 = vmatmul.mubr.msk.bf16.gmra.mxu0 %vm511_vm0, %v2501_v5 }
  0x27   : > { %2412 = vmatprep.mubr.msk.bf16.mxu0 %vm511_vm0, %v2502_v6  ;;  %v715_v31 = vrot.slane %v683_v17, %v2780_v20 }
  0x2e   : > { %2413 = vmatmul.mubr.msk.bf16.gmra.mxu0 %vm511_vm0, %v2749_v7 }
  0x2f   : > { %2416 = vmatprep.mubr.msk.bf16.mxu0 %vm511_vm0, %v2752_v8 }
  0x36   : > { %2417 = vmatmul.mubr.msk.bf16.gmra.mxu0 %vm511_vm0, %v2759_v9 }
  0xde   : > { %v2406_v26 = vpop.f32.mrf.mxu0 }
  0xdf   : > { %v726_v29 = vadd.f32 %v2406_v26, %v691_v23 }
  0xe0   : > { %v570_v30 = vpop.f32.mrf.mxu0 }
  0xe1   : > { %v744_v33 = vadd.f32 %v2789_v27, %v726_v29  ;;  %v724_v34 = vadd.f32 %v687_v25, %v570_v30 }
  0xe2   : > { %v2407_v35 = vpop.f32.mrf.mxu0 }
  0xe3   : > { %v776_v38 = vmul.f32 0.01, %v744_v33  ;;  %v742_v39 = vadd.f32 %v2789_v27, %v724_v34  ;;  %v727_v40 = vadd.f32 %v2407_v35, %v691_v23  ;;  %vm760_vm1 = vcmp.ge.f32.partialorder %v744_v33, 0.0 }
  0xe4   : > { %v573_v42 = vpop.f32.mrf.mxu0 }
  0xe5   : > { %v774_v45 = vmul.f32 0.01, %v742_v39  ;;  %v745_v46 = vadd.f32 %v2795_v36, %v727_v40  ;;  %v725_v47 = vadd.f32 %v687_v25, %v573_v42  ;;  %v792_v48 = vsel %vm760_vm1, %v744_v33, %v776_v38 }
  0xe6   : > { %v2410_v49 = vpop.f32.mrf.mxu0  ;;  %v815_v50 = vmul.f32 %v2802_v41, %v792_v48  ;;  %vm758_vm2 = vcmp.ge.f32.partialorder %v742_v39, 0.0  ;;  %v681_v33 = vcombine.high %v2809_v51, %v2809_v51 }
  0xe7   : > { %v777_v52 = vmul.f32 0.01, %v745_v46  ;;  %v743_v53 = vadd.f32 %v2795_v36, %v725_v47  ;;  %v730_v54 = vadd.f32 %v2410_v49, %v699_v37  ;;  %v790_v55 = vsel %vm758_vm2, %v742_v39, %v774_v45 }
  0xe8   : > { %v586_v56 = vpop.f32.mrf.mxu0  ;;  %v835_v57 = vsel %vm511_vm0, %v815_v50, 0.0  ;;  %v813_v58 = vmul.f32 %v2802_v41, %v790_v55  ;;  %vm761_vm3 = vcmp.ge.f32.partialorder %v745_v46, 0.0  ;;  %v711_v50 = vrot.slane %v681_v33, %v2780_v20 }
  0xe9   : > { %v775_v60 = vmul.f32 0.01, %v743_v53  ;;  %v748_v61 = vadd.f32 %v2789_v27, %v730_v54  ;;  %v728_v62 = vadd.f32 %v695_v43, %v586_v56  ;;  %836 = vadd.xlane.f32.xlu1 %v835_v57  ;;  %v793_v63 = vsel %vm761_vm3, %v745_v46, %v777_v52 }
  0xea   : > { %v2411_v0 = vpop.f32.mrf.mxu0  ;;  %v829_v1 = vsel %vm511_vm0, %v813_v58, 0.0  ;;  %v816_v2 = vmul.f32 %v2802_v41, %v793_v63  ;;  %vm759_vm4 = vcmp.ge.f32.partialorder %v743_v53, 0.0  ;;  %vm904_vm2 = vcmask 130112  }
  0xeb   : > { %v780_v4 = vmul.f32 0.01, %v748_v61  ;;  %v746_v5 = vadd.f32 %v2789_v27, %v728_v62  ;;  %v731_v6 = vadd.f32 %v2411_v0, %v699_v37  ;;  %830 = vadd.xlane.f32.xlu0 %v829_v1  ;;  %v791_v10 = vsel %vm759_vm4, %v743_v53, %v775_v60 }
  0xec   : > { %v589_v11 = vpop.f32.mrf.mxu0  ;;  %v838_v13 = vsel %vm511_vm0, %v816_v2, 0.0  ;;  %v814_v16 = vmul.f32 %v2802_v41, %v791_v10  ;;  %vm764_vm5 = vcmp.ge.f32.partialorder %v748_v61, 0.0  ;;  %vm969_vm3 = vcmask 1041409  }
  0xed   : > { %v778_v18 = vmul.f32 0.01, %v746_v5  ;;  %v749_v19 = vadd.f32 %v2795_v36, %v731_v6  ;;  %v729_v21 = vadd.f32 %v695_v43, %v589_v11  ;;  %839 = vadd.xlane.f32.xlu1 %v838_v13  ;;  %v796_v22 = vsel %vm764_vm5, %v748_v61, %v780_v4 }
  0xee   : > { %v2414_v23 = vpop.f32.mrf.mxu0  ;;  %v832_v24 = vsel %vm511_vm0, %v814_v16, 0.0  ;;  %v819_v25 = vmul.f32 %v2802_v41, %v796_v22  ;;  %vm762_vm6 = vcmp.ge.f32.partialorder %v746_v5, 0.0  ;;  %vm971_vm4 = vcmask 1042434  }
  0xef   : > { %v781_v26 = vmul.f32 0.01, %v749_v19  ;;  %v747_v28 = vadd.f32 %v2795_v36, %v729_v21  ;;  %v734_v29 = vadd.f32 %v2414_v23, %v707_v59  ;;  %833 = vadd.xlane.f32.xlu0 %v832_v24  ;;  %vm765_vm7 = vcmp.ge.f32.partialorder %v749_v19, 0.0 }
  0xf0   : > { %v602_v30 = vpop.f32.mrf.mxu0  ;;  %v794_v32 = vsel %vm762_vm6, %v746_v5, %v778_v18  ;;  %v847_v40 = vsel %vm511_vm0, %v819_v25, 0.0  ;;  %vm973_vm5 = vcmask 1043459   ;;  %vm975_vm6 = vcmask 1044484  }
  0xf1   : > { %v779_v34 = vmul.f32 0.01, %v747_v28  ;;  %v752_v35 = vadd.f32 %v2789_v27, %v734_v29  ;;  %v732_v37 = vadd.f32 %v703_v3, %v602_v30  ;;  %v797_v38 = vsel %vm765_vm7, %v749_v19, %v781_v26 }
  0xf2   : > { %v2415_v39 = vpop.f32.mrf.mxu0  ;;  %v820_v42 = vmul.f32 %v2802_v41, %v797_v38  ;;  %v817_v43 = vmul.f32 %v2802_v41, %v794_v32  ;;  %vm763_vm8 = vcmp.ge.f32.partialorder %v747_v28, 0.0  ;;  %vm977_vm7 = vcmask 1045509  }
  0xf3   : > { %v784_v44 = vmul.f32 0.01, %v752_v35  ;;  %v750_v45 = vadd.f32 %v2789_v27, %v732_v37  ;;  %v735_v46 = vadd.f32 %v2415_v39, %v707_v59  ;;  %848 = vadd.xlane.f32.xlu0 %v847_v40  ;;  %v795_v47 = vsel %vm763_vm8, %v747_v28, %v779_v34 }
  0xf4   : > { %v605_v48 = vpop.f32.mrf.mxu0  ;;  %v850_v49 = vsel %vm511_vm0, %v820_v42, 0.0  ;;  %v818_v51 = vmul.f32 %v2802_v41, %v795_v47  ;;  %vm768_vm9 = vcmp.ge.f32.partialorder %v752_v35, 0.0  ;;  %v841_v57 = vsel %vm511_vm0, %v817_v43, 0.0 }
  0xf5   : > { %v782_v52 = vmul.f32 0.01, %v750_v45  ;;  %v753_v53 = vadd.f32 %v2795_v36, %v735_v46  ;;  %v733_v54 = vadd.f32 %v703_v3, %v605_v48  ;;  %851 = vadd.xlane.f32.xlu1 %v850_v49  ;;  %v800_v55 = vsel %vm768_vm9, %v752_v35, %v784_v44 }
  0xf6   : > { %v2418_v56 = vpop.f32.mrf.mxu0  ;;  %v823_v58 = vmul.f32 %v2802_v41, %v800_v55  ;;  %vm766_vm10 = vcmp.ge.f32.partialorder %v750_v45, 0.0  ;;  %v844_v63 = vsel %vm511_vm0, %v818_v51, 0.0  ;;  %vm979_vm8 = vcmask 1046534  }
  0xf7   : > { %v785_v59 = vmul.f32 0.01, %v753_v53  ;;  %v751_v60 = vadd.f32 %v2795_v36, %v733_v54  ;;  %v738_v61 = vadd.f32 %v2418_v56, %v715_v31  ;;  %842 = vadd.xlane.f32.xlu0 %v841_v57  ;;  %vm769_vm11 = vcmp.ge.f32.partialorder %v753_v53, 0.0 }
  0xf8   : > { %v618_v62 = vpop.f32.mrf.mxu0  ;;  %v798_v0 = vsel %vm766_vm10, %v750_v45, %v782_v52  ;;  %v859_v6 = vsel %vm511_vm0, %v823_v58, 0.0  ;;  %vm981_vm9 = vcmask 1047559   ;;  %vm984_vm10 = vcmask 130048  }
  0xf9   : > { %v783_v1 = vmul.f32 0.01, %v751_v60  ;;  %v756_v2 = vadd.f32 %v2789_v27, %v738_v61  ;;  %v736_v3 = vadd.f32 %v711_v50, %v618_v62  ;;  %845 = vadd.xlane.f32.xlu1 %v844_v63  ;;  %v801_v4 = vsel %vm769_vm11, %v753_v53, %v785_v59 }
  0xfa   : > { %v2419_v5 = vpop.f32.mrf.mxu0  ;;  %v824_v10 = vmul.f32 %v2802_v41, %v801_v4  ;;  %v821_v11 = vmul.f32 %v2802_v41, %v798_v0  ;;  %vm767_vm12 = vcmp.ge.f32.partialorder %v751_v60, 0.0  ;;  %vm2615_vm11 = vmmov 0  }
  0xfb   : > { %v788_v13 = vmul.f32 0.01, %v756_v2  ;;  %v754_v16 = vadd.f32 %v2789_v27, %v736_v3  ;;  %v739_v17 = vadd.f32 %v2419_v5, %v715_v31  ;;  %860 = vadd.xlane.f32.xlu0 %v859_v6  ;;  %v799_v18 = vsel %vm767_vm12, %v751_v60, %v783_v1 }
  0xfc   : > { %v621_v19 = vpop.f32.mrf.mxu0  ;;  %v862_v21 = vsel %vm511_vm0, %v824_v10, 0.0  ;;  %v822_v22 = vmul.f32 %v2802_v41, %v799_v18  ;;  %vm772_vm13 = vcmp.ge.f32.partialorder %v756_v2, 0.0  ;;  %v853_v26 = vsel %vm511_vm0, %v821_v11, 0.0 }
  0xfd   : > { %v786_v23 = vmul.f32 0.01, %v754_v16  ;;  %v757_v24 = vadd.f32 %v2795_v36, %v739_v17  ;;  %v737_v25 = vadd.f32 %v711_v50, %v621_v19  ;;  %863 = vadd.xlane.f32.xlu1 %v862_v21  ;;  %vm770_vm14 = vcmp.ge.f32.partialorder %v754_v16, 0.0 }
  0xfe   : > { %v804_v30 = vsel %vm772_vm13, %v756_v2, %v788_v13  ;;  %v856_v31 = vsel %vm511_vm0, %v822_v22, 0.0  ;;  %v894_v50 = vand.u32 127, %v639_v12 }
  0xff   : > { %v789_v28 = vmul.f32 0.01, %v757_v24  ;;  %v755_v27 = vadd.f32 %v2795_v36, %v737_v25  ;;  %854 = vadd.xlane.f32.xlu0 %v853_v26  ;;  %v802_v29 = vsel %vm770_vm14, %v754_v16, %v786_v23  ;;  %vm773_vm15 = vcmp.ge.f32.partialorder %v757_v24, 0.0 }
 0x100   : > { %v825_v32 = vmul.f32 %v2802_v41, %v802_v29  ;;  %v827_v35 = vmul.f32 %v2802_v41, %v804_v30  ;;  %v899_v51 = vadd.s32 4294967288, %v894_v50  ;;  %v2887_v56 = vsub.s32 %v894_v50, %v2768_v14 }
 0x101   : > { %v787_v33 = vmul.f32 0.01, %v755_v27  ;;  %857 = vadd.xlane.f32.xlu1 %v856_v31  ;;  %vm771_vm1 = vcmp.ge.f32.partialorder %v755_v27, 0.0  ;;  %v805_v38 = vsel %vm773_vm15, %v757_v24, %v789_v28 }
 0x102   : > { %v865_v34 = vsel %vm511_vm0, %v825_v32, 0.0  ;;  %v871_v40 = vsel %vm511_vm0, %v827_v35, 0.0  ;;  %v828_v42 = vmul.f32 %v2802_v41, %v805_v38  ;;  %v2882_v54 = vsub.s32 %v899_v51, %v2768_v14 }
 0x103   : > { %866 = vadd.xlane.f32.xlu0 %v865_v34  ;;  %v803_v37 = vsel %vm771_vm1, %v755_v27, %v787_v33  ;;  %v2613_v38 = vmov 0  }
 0x104   : > { %v826_v36 = vmul.f32 %v2802_v41, %v803_v37  ;;  %v874_v43 = vsel %vm511_vm0, %v828_v42, 0.0  ;;  %2495 = vset.pattern.permute.xlu0 %v2613_v38  ;;  %2494 = vset.pattern.permute.xlu1 %v2613_v38 }
 0x106   : > { %v868_v39 = vsel %vm511_vm0, %v826_v36, 0.0  ;;  %v2950_v36 = vsub.s32 1, %v2768_v14 }
 0x107   : > { %869 = vadd.xlane.f32.xlu1 %v868_v39  ;;  %872 = vadd.xlane.f32.xlu0 %v871_v40 }
 0x10b   : > { %875 = vadd.xlane.f32.xlu1 %v874_v43  ;;  %v2955_v43 = vsub.s32 5, %v2768_v14 }
 0x172   : > { %v2862_v44 = vpop.xlane.xlu1 %836 }
 0x173   : > { %v909_v63 = vrot.slane %v2862_v44, %v2887_v56 }
 0x174   : > { %v2864_v45 = vpop.xlane.xlu0 %830 }
 0x175   : > { %v898_v59 = vrot.slane %v2864_v45, %v2887_v56 }
 0x176   : > { %v2868_v47 = vpop.xlane.xlu1 %839 }
 0x177   : > { %v913_v60 = vrot.slane %v2868_v47, %v2882_v54 }
 0x178   : > { %v2866_v46 = vpop.xlane.xlu0 %833 }
 0x179   : > { %v903_v57 = vrot.slane %v2866_v46, %v2882_v54  ;;  %v914_v4 = vsel %vm904_vm2, %v913_v60, %v909_v63 }
 0x17b   : > { %v905_v0 = vsel %vm904_vm2, %v903_v57, %v898_v59  ;;  %v2960_v57 = vsub.s32 2, %v2768_v14  ;;  %v2964_v59 = vsub.s32 6, %v2768_v14 }
 0x17c   : > { %v2870_v48 = vpop.xlane.xlu0 %848  ;;  %v970_v6 = vsel %vm969_vm3, %v914_v4, %v905_v0  ;;  %v2978_v4 = vsub.s32 3, %v2768_v14 }
 0x17d   : > { %v927_v11 = vrot.slane %v2870_v48, %v2887_v56 }
 0x17e   : > { %v2872_v49 = vpop.xlane.xlu1 %851 }
 0x17f   : > { %v931_v5 = vrot.slane %v2872_v49, %v2882_v54 }
 0x180   : > { %v2875_v41 = vpop.xlane.xlu0 %842 }
 0x181   : > { %v918_v61 = vrot.slane %v2875_v41, %v2887_v56  ;;  %v932_v18 = vsel %vm904_vm2, %v931_v5, %v927_v11 }
 0x182   : > { %v2877_v52 = vpop.xlane.xlu1 %845 }
 0x183   : > { %v922_v12 = vrot.slane %v2877_v52, %v2882_v54 }
 0x184   : > { %v2879_v53 = vpop.xlane.xlu0 %860 }
 0x185   : > { %v923_v1 = vsel %vm904_vm2, %v922_v12, %v918_v61  ;;  %v945_v25 = vrot.slane %v2879_v53, %v2887_v56 }
 0x186   : > { %v2884_v55 = vpop.xlane.xlu1 %863  ;;  %v972_v13 = vsel %vm971_vm4, %v923_v1, %v970_v6 }
 0x187   : > { %v949_v19 = vrot.slane %v2884_v55, %v2882_v54  ;;  %v974_v24 = vsel %vm973_vm5, %v932_v18, %v972_v13 }
 0x188   : > { %v2893_v58 = vpop.xlane.xlu0 %854 }
 0x189   : > { %v936_v10 = vrot.slane %v2893_v58, %v2887_v56  ;;  %v950_v29 = vsel %vm904_vm2, %v949_v19, %v945_v25 }
 0x18a   : > { %v2901_v62 = vpop.xlane.xlu1 %857 }
 0x18b   : > { %v940_v2 = vrot.slane %v2901_v62, %v2882_v54 }
 0x18c   : > { %v2909_v3 = vpop.xlane.xlu0 %866 }
 0x18d   : > { %v941_v16 = vsel %vm904_vm2, %v940_v2, %v936_v10  ;;  %v954_v22 = vrot.slane %v2909_v3, %v2887_v56 }
 0x18e   : > { %v976_v26 = vsel %vm975_vm6, %v941_v16, %v974_v24 }
 0x18f   : > { %v978_v32 = vsel %vm977_vm7, %v950_v29, %v976_v26 }
 0x190   : > { %v2921_v17 = vpop.xlane.xlu1 %869  ;;  %v2930_v23 = vpop.xlane.xlu0 %872 }
 0x191   : > { %v958_v21 = vrot.slane %v2921_v17, %v2882_v54  ;;  %v963_v30 = vrot.slane %v2930_v23, %v2887_v56 }
 0x193   : > { %v959_v27 = vsel %vm904_vm2, %v958_v21, %v954_v22  ;;  %v2987_v21 = vsub.s32 4, %v2768_v14 }
 0x194   : > { %v2936_v28 = vpop.xlane.xlu1 %875  ;;  %v980_v34 = vsel %vm979_vm8, %v959_v27, %v978_v32 }
 0x195   : > { %v967_v31 = vrot.slane %v2936_v28, %v2882_v54 }
 0x197   : > { %v968_v33 = vsel %vm904_vm2, %v967_v31, %v963_v30 }
 0x198   : > { %v982_v35 = vsel %vm981_vm9, %v968_v33, %v980_v34 }
 0x199   : > { %v985_v37 = vsel %vm984_vm10, %v982_v35, -inf }
 0x19a   : > { %986 = vmax.xlane.f32.xlu0 %v985_v37 }
 0x223   : > { %v987_v39 = vpop.xlane.xlu0 %986 }
 0x224   : > { %v992_v40 = vrot.slane %v987_v39, %v2780_v20  ;;  %v996_v42 = vrot.slane %v987_v39, %v2950_v36  ;;  %v2967_v60 = vrot.slane %v987_v39, %v2955_v43  ;;  %v1000_v0 = vrot.slane %v987_v39, %v2960_v57 }
 0x225   : > { %v1004_v13 = vrot.slane %v987_v39, %v2978_v4 }
 0x226   : > { %v1029_v50 = vsub.f32 %v2864_v45, %v992_v40  ;;  %v1030_v51 = vsub.f32 %v2866_v46, %v992_v40  ;;  %v1031_v12 = vsub.f32 %v2862_v44, %v996_v42  ;;  %v1032_v1 = vsub.f32 %v2868_v47, %v996_v42 }
 0x227   : > { %v2972_v46 = vsub.s32 7, %v2768_v14  ;;  %v1016_v44 = vrot.slane %v987_v39, %v2964_v59  ;;  %v1039_v2 = vsub.f32 %v2879_v53, %v2967_v60  ;;  %v1033_v5 = vsub.f32 %v2875_v41, %v1000_v0 }
 0x228   : > { %v1045_v61 = vmul.f32 1.442695, %v1029_v50  ;;  %v1047_v63 = vmul.f32 1.442695, %v1030_v51  ;;  %v1049_v45 = vmul.f32 1.442695, %v1031_v12  ;;  %v1034_v16 = vsub.f32 %v2877_v52, %v1000_v0 }
 0x229   : > { %v1051_v6 = vmul.f32 1.442695, %v1032_v1  ;;  %v1020_v47 = vrot.slane %v987_v39, %v2972_v46  ;;  %v1041_v10 = vsub.f32 %v2909_v3, %v1016_v44  ;;  %v1065_v11 = vmul.f32 1.442695, %v1039_v2 }
 0x22a   : > { %2510 = vpow2.f32 %v1045_v61  ;;  %v1053_v18 = vmul.f32 1.442695, %v1033_v5  ;;  %v1035_v41 = vsub.f32 %v2870_v48, %v1004_v13  ;;  %v1055_v22 = vmul.f32 1.442695, %v1034_v16 }
 0x22b   : > { %2512 = vpow2.f32 %v1047_v63  ;;  %v1043_v53 = vsub.f32 %v2930_v23, %v1020_v47  ;;  %v1069_v19 = vmul.f32 1.442695, %v1041_v10  ;;  %v1008_v52 = vrot.slane %v987_v39, %v2987_v21 }
 0x22c   : > { %2514 = vpow2.f32 %v1049_v45  ;;  %v1036_v23 = vsub.f32 %v2872_v49, %v1004_v13  ;;  %v1057_v14 = vmul.f32 1.442695, %v1035_v41  ;;  %v1042_v37 = vsub.f32 %v2921_v17, %v1016_v44 }
 0x22d   : > { %2516 = vpow2.f32 %v1051_v6  ;;  %v1073_v25 = vmul.f32 1.442695, %v1043_v53  ;;  %v1037_v48 = vsub.f32 %v2893_v58, %v1008_v52  ;;  %v1038_v31 = vsub.f32 %v2901_v62, %v1008_v52 }
 0x22e   : > { %2518 = vpow2.f32 %v1065_v11  ;;  %v1059_v27 = vmul.f32 1.442695, %v1036_v23  ;;  %v1040_v58 = vsub.f32 %v2884_v55, %v2967_v60  ;;  %v1044_v55 = vsub.f32 %v2936_v28, %v1020_v47  ;;  %v1285_v60 = vld [vmem:[%s437_s14] sm:$0xff] }
 0x22f   : > { %2520 = vpow2.f32 %v1053_v18  ;;  %v1061_v49 = vmul.f32 1.442695, %v1037_v48  ;;  %v1063_v34 = vmul.f32 1.442695, %v1038_v31  ;;  %v1071_v40 = vmul.f32 1.442695, %v1042_v37 }
 0x230   : > { %2522 = vpow2.f32 %v1069_v19  ;;  %v1067_v38 = vmul.f32 1.442695, %v1040_v58  ;;  %v1075_v50 = vmul.f32 1.442695, %v1044_v55  ;;  %v1290_v63 = vrot.slane %v1285_v60, %v2780_v20 }
 0x231   : > { %2524 = vpow2.f32 %v1055_v22  ;;  %v1301_v0 = vrot.slane %v1285_v60, %v2950_v36  ;;  %v1312_v1 = vrot.slane %v1285_v60, %v2960_v57  ;;  %v1323_v45 = vrot.slane %v1285_v60, %v2978_v4 }
 0x232   : > { %2526 = vpow2.f32 %v1073_v25  ;;  %v1334_v44 = vrot.slane %v1285_v60, %v2987_v21  ;;  %v1345_v2 = vrot.slane %v1285_v60, %v2955_v43  ;;  %v1356_v5 = vrot.slane %v1285_v60, %v2964_v59 }
 0x233   : > { %2528 = vpow2.f32 %v1057_v14  ;;  %v1367_v6 = vrot.slane %v1285_v60, %v2972_v46 }
 0x234   : > { %2530 = vpow2.f32 %v1059_v27 }
 0x235   : > { %2532 = vpow2.f32 %v1061_v49 }
 0x236   : > { %2534 = vpow2.f32 %v1063_v34 }
 0x237   : > { %v2990_v24 = vpop.eup %2510  ;;  %2536 = vpow2.f32 %v1067_v38 }
 0x238   : > { %v2992_v3 = vpop.eup %2512  ;;  %1094 = vperm.xlu1 %2494, %v2990_v24   ;;  %2538 = vpow2.f32 %v1071_v40 }
 0x239   : > { %1097 = vperm.xlu0 %2495, %v2992_v3   ;;  %v2998_v26 = vpop.eup %2514  ;;  %2540 = vpow2.f32 %v1075_v50 }
 0x23a   : > { %v3002_v29 = vpop.eup %2516 }
 0x23b   : > { %v3005_v30 = vpop.eup %2518 }
 0x23c   : > { %1100 = vperm.xlu1 %2494, %v2998_v26   ;;  %v3009_v32 = vpop.eup %2520 }
 0x23d   : > { %1124 = vperm.xlu0 %2495, %v3005_v30   ;;  %v3012_v33 = vpop.eup %2522 }
 0x23e   : > { %v3017_v35 = vpop.eup %2524 }
 0x23f   : > { %v3020_v62 = vpop.eup %2526 }
 0x240   : > { %1103 = vperm.xlu1 %2494, %v3002_v29   ;;  %v3024_v39 = vpop.eup %2528 }
 0x241   : > { %1130 = vperm.xlu0 %2495, %v3012_v33   ;;  %v3028_v42 = vpop.eup %2530 }
 0x242   : > { %v3031_v17 = vpop.eup %2532 }
 0x243   : > { %v3034_v51 = vpop.eup %2534 }
 0x244   : > { %1106 = vperm.xlu1 %2494, %v3009_v32   ;;  %v3037_v12 = vpop.eup %2536 }
 0x245   : > { %1136 = vperm.xlu0 %2495, %v3020_v62   ;;  %v3044_v28 = vpop.eup %2538 }
 0x246   : > { %v3047_v61 = vpop.eup %2540 }
 0x248   : > { %1109 = vperm.xlu1 %2494, %v3017_v35  }
 0x24c   : > { %1112 = vperm.xlu1 %2494, %v3024_v39  }
 0x250   : > { %1115 = vperm.xlu1 %2494, %v3028_v42  }
 0x254   : > { %1118 = vperm.xlu1 %2494, %v3031_v17  }
 0x258   : > { %1121 = vperm.xlu1 %2494, %v3034_v51  }
 0x25c   : > { %1127 = vperm.xlu1 %2494, %v3037_v12  }
 0x260   : > { %1133 = vperm.xlu1 %2494, %v3044_v28  }
 0x264   : > { %1139 = vperm.xlu1 %2494, %v3047_v61  }
 0x268   : > { %1292 = vbcast.lane.b32.xlu1 %v1290_v63, 256 }
 0x26c   : > { %1296 = vbcast.lane.b32.xlu1 %v1290_v63, 264 }
 0x270   : > { %1303 = vbcast.lane.b32.xlu1 %v1301_v0, 256 }
 0x274   : > { %1307 = vbcast.lane.b32.xlu1 %v1301_v0, 264 }
 0x278   : > { %1314 = vbcast.lane.b32.xlu1 %v1312_v1, 256 }
 0x27c   : > { %1318 = vbcast.lane.b32.xlu1 %v1312_v1, 264 }
 0x280   : > { %1325 = vbcast.lane.b32.xlu1 %v1323_v45, 256 }
 0x284   : > { %1329 = vbcast.lane.b32.xlu1 %v1323_v45, 264 }
 0x288   : > { %1340 = vbcast.lane.b32.xlu1 %v1334_v44, 264 }
 0x28c   : > { %1347 = vbcast.lane.b32.xlu1 %v1345_v2, 256 }
 0x290   : > { %1351 = vbcast.lane.b32.xlu1 %v1345_v2, 264 }
 0x294   : > { %1358 = vbcast.lane.b32.xlu1 %v1356_v5, 256 }
 0x298   : > { %1362 = vbcast.lane.b32.xlu1 %v1356_v5, 264 }
 0x29c   : > { %1373 = vbcast.lane.b32.xlu1 %v1367_v6, 264 }
 0x2b3   : > { %v1095_v47 = vpop.permute.xlu1 %1094 }
 0x2b4   : > { %v1098_v53 = vpop.permute.xlu0 %1097  ;;  %v1144_v31 = vrot.slane %v1095_v47, %v2887_v56 }
 0x2b5   : > { %v1148_v27 = vrot.slane %v1098_v53, %v2882_v54 }
 0x2b7   : > { %v1101_v10 = vpop.permute.xlu1 %1100  ;;  %v1149_v0 = vsel %vm904_vm2, %v1148_v27, %v1144_v31 }
 0x2b8   : > { %v1125_v22 = vpop.permute.xlu0 %1124  ;;  %v1153_v49 = vrot.slane %v1101_v10, %v2887_v56 }
 0x2b9   : > { %v1189_v1 = vrot.slane %v1125_v22, %v2887_v56 }
 0x2bb   : > { %v1104_v11 = vpop.permute.xlu1 %1103 }
 0x2bc   : > { %v1157_v52 = vrot.slane %v1104_v11, %v2882_v54  ;;  %v1131_v23 = vpop.permute.xlu0 %1130 }
 0x2bd   : > { %v1198_v5 = vrot.slane %v1131_v23, %v2887_v56 }
 0x2be   : > { %v1158_v38 = vsel %vm904_vm2, %v1157_v52, %v1153_v49 }
 0x2bf   : > { %v1107_v13 = vpop.permute.xlu1 %1106  ;;  %v1213_v47 = vsel %vm969_vm3, %v1158_v38, %v1149_v0 }
 0x2c0   : > { %v1162_v34 = vrot.slane %v1107_v13, %v2887_v56  ;;  %v1137_v10 = vpop.permute.xlu0 %1136 }
 0x2c3   : > { %v1110_v16 = vpop.permute.xlu1 %1109 }
 0x2c4   : > { %v1166_v14 = vrot.slane %v1110_v16, %v2882_v54 }
 0x2c6   : > { %v1167_v50 = vsel %vm904_vm2, %v1166_v14, %v1162_v34 }
 0x2c7   : > { %v1113_v18 = vpop.permute.xlu1 %1112  ;;  %v1214_v13 = vsel %vm971_vm4, %v1167_v50, %v1213_v47 }
 0x2c8   : > { %v1171_v55 = vrot.slane %v1113_v18, %v2887_v56 }
 0x2cb   : > { %v1116_v19 = vpop.permute.xlu1 %1115 }
 0x2cc   : > { %v1175_v58 = vrot.slane %v1116_v19, %v2882_v54 }
 0x2ce   : > { %v1176_v45 = vsel %vm904_vm2, %v1175_v58, %v1171_v55 }
 0x2cf   : > { %v1119_v41 = vpop.permute.xlu1 %1118  ;;  %v1215_v18 = vsel %vm973_vm5, %v1176_v45, %v1214_v13 }
 0x2d0   : > { %v1180_v60 = vrot.slane %v1119_v41, %v2887_v56  ;;  %v1207_v41 = vrot.slane %v1137_v10, %v2887_v56 }
 0x2d3   : > { %v1122_v25 = vpop.permute.xlu1 %1121 }
 0x2d4   : > { %v1184_v37 = vrot.slane %v1122_v25, %v2882_v54 }
 0x2d6   : > { %v1185_v11 = vsel %vm904_vm2, %v1184_v37, %v1180_v60 }
 0x2d7   : > { %v1128_v48 = vpop.permute.xlu1 %1127  ;;  %v1216_v22 = vsel %vm975_vm6, %v1185_v11, %v1215_v18 }
 0x2d8   : > { %v1193_v40 = vrot.slane %v1128_v48, %v2882_v54 }
 0x2da   : > { %v1194_v16 = vsel %vm904_vm2, %v1193_v40, %v1189_v1 }
 0x2db   : > { %v1134_v63 = vpop.permute.xlu1 %1133  ;;  %v1217_v52 = vsel %vm977_vm7, %v1194_v16, %v1216_v22 }
 0x2dc   : > { %v1202_v2 = vrot.slane %v1134_v63, %v2882_v54 }
 0x2de   : > { %v1203_v53 = vsel %vm904_vm2, %v1202_v2, %v1198_v5 }
 0x2df   : > { %v1140_v19 = vpop.permute.xlu1 %1139  ;;  %v1218_v14 = vsel %vm979_vm8, %v1203_v53, %v1217_v52 }
 0x2e0   : > { %v1211_v25 = vrot.slane %v1140_v19, %v2882_v54 }
 0x2e2   : > { %v1212_v23 = vsel %vm904_vm2, %v1211_v25, %v1207_v41 }
 0x2e3   : > { %v1219_v48 = vsel %vm981_vm9, %v1212_v23, %v1218_v14  ;;  %v1293_v31 = vpop.permute.xlu1 %1292 }
 0x2e4   : > { %v1221_v27 = vsel %vm984_vm10, %v1219_v48, 0.0 }
 0x2e5   : > { %1222 = vadd.xlane.f32.xlu0 %v1221_v27 }
 0x2e7   : > { %v1297_v49 = vpop.permute.xlu1 %1296 }
 0x2eb   : > { %v1304_v58 = vpop.permute.xlu1 %1303 }
 0x2ef   : > { %v1308_v34 = vpop.permute.xlu1 %1307 }
 0x2f3   : > { %v1315_v37 = vpop.permute.xlu1 %1314 }
 0x2f7   : > { %v1319_v55 = vpop.permute.xlu1 %1318 }
 0x2fb   : > { %1336 = vbcast.lane.b32.xlu0 %v1334_v44, 256  ;;  %v1326_v40 = vpop.permute.xlu1 %1325 }
 0x2ff   : > { %1369 = vbcast.lane.b32.xlu0 %v1367_v6, 256  ;;  %v1330_v0 = vpop.permute.xlu1 %1329 }
 0x303   : > { %v1341_v2 = vpop.permute.xlu1 %1340 }
 0x307   : > { %v1348_v18 = vpop.permute.xlu1 %1347 }
 0x36e   : > { %v1223_v38 = vpop.xlane.xlu0 %1222 }
 0x36f   : > { %2542 = vrcp.f32 %v1223_v38 }
 0x37c   : > { %v2543_v50 = vpop.eup %2542 }
 0x37d   : > { %v1225_v60 = vmul.f32 %v2543_v50, %v1223_v38 }
 0x37f   : > { %v1226_v63 = vsub.f32 2.0, %v1225_v60 }
 0x381   : > { %v1227_v1 = vmul.f32 %v2543_v50, %v1226_v63 }
 0x383   : > { %v1232_v45 = vrot.slane %v1227_v1, %v2780_v20  ;;  %v1236_v44 = vrot.slane %v1227_v1, %v2950_v36  ;;  %v1240_v47 = vrot.slane %v1227_v1, %v2960_v57  ;;  %v1244_v53 = vrot.slane %v1227_v1, %v2978_v4 }
 0x385   : > { %v1269_v6 = vmul.f32 %v2990_v24, %v1232_v45  ;;  %v1270_v5 = vmul.f32 %v2992_v3, %v1232_v45  ;;  %v1271_v13 = vmul.f32 %v2998_v26, %v1236_v44  ;;  %v1272_v16 = vmul.f32 %v3002_v29, %v1236_v44  ;;  %v1352_v29 = vpop.permute.xlu1 %1351  ;;  %v2546_v45 = vld [vmem:[%s2735_s24 + $0x8] sm:$0xff]   ;;  %v2548_v44 = vld [vmem:[%s2735_s24 + $0x18] sm:$0xff]  }
 0x386   : > { %v1273_v19 = vmul.f32 %v3009_v32, %v1240_v47  ;;  %v1274_v41 = vmul.f32 %v3017_v35, %v1240_v47  ;;  %v1248_v26 = vrot.slane %v1227_v1, %v2987_v21  ;;  %v1276_v22 = vmul.f32 %v3028_v42, %v1244_v53 }
 0x387   : > { %v3095_v10 = vmul.f32 %v1293_v31, %v1269_v6  ;;  %v3097_v11 = vmul.f32 %v1297_v49, %v1270_v5  ;;  %v3104_v24 = vmul.f32 %v1304_v58, %v1271_v13  ;;  %v3106_v3 = vmul.f32 %v1308_v34, %v1272_v16  ;;  %v1337_v31 = vpop.permute.xlu0 %1336  ;;  %v2549_v6 = vld [vmem:[%s2735_s24 + $0x20] sm:$0xff]  }
 0x388   : > { %v3114_v25 = vmul.f32 %v1315_v37, %v1273_v19  ;;  %v3116_v52 = vmul.f32 %v1319_v55, %v1274_v41  ;;  %v1275_v23 = vmul.f32 %v3024_v39, %v1244_v53  ;;  %v1252_v32 = vrot.slane %v1227_v1, %v2955_v43 }
 0x389   : > { %1424 = vperm.xlu0 %2495, %v3095_v10   ;;  %1427 = vperm.xlu1 %2494, %v3097_v11   ;;  %v3122_v35 = vmul.f32 %v1330_v0, %v1276_v22  ;;  %v1278_v14 = vmul.f32 %v3034_v51, %v1248_v26  ;;  %v1277_v48 = vmul.f32 %v3031_v17, %v1248_v26  ;;  %v1359_v42 = vpop.permute.xlu1 %1358 }
 0x38a   : > { %v3126_v27 = vmul.f32 %v1326_v40, %v1275_v23  ;;  %v1256_v39 = vrot.slane %v1227_v1, %v2964_v59  ;;  %v1279_v58 = vmul.f32 %v3005_v30, %v1252_v32  ;;  %v1280_v34 = vmul.f32 %v3037_v12, %v1252_v32 }
 0x38b   : > { %v3131_v49 = vmul.f32 %v1341_v2, %v1278_v14  ;;  %v3135_v37 = vmul.f32 %v1337_v31, %v1277_v48  ;;  %v1260_v51 = vrot.slane %v1227_v1, %v2972_v46  ;;  %v1370_v0 = vpop.permute.xlu0 %1369  ;;  %v2547_v2 = vld [vmem:[%s2735_s24 + $0x10] sm:$0xff]   ;;  %s2372_s24 = sshll.u32 %s2698_s21, 7  ;;  %s2616_s21 = smov [#allocation2]  }
 0x38c   : > { %v3140_v38 = vmul.f32 %v1348_v18, %v1279_v58  ;;  %v3142_v55 = vmul.f32 %v1352_v29, %v1280_v34  ;;  %v1281_v40 = vmul.f32 %v3012_v33, %v1256_v39  ;;  %v1282_v50 = vmul.f32 %v3044_v28, %v1256_v39  ;;  %s3410_s14 = scalar_lea.hbm %s3457_s11, %s2372_s24 }
 0x38d   : > { %1430 = vperm.xlu0 %2495, %v3104_v24   ;;  %1433 = vperm.xlu1 %2494, %v3106_v3   ;;  %v1363_v17 = vpop.permute.xlu1 %1362  ;;  %v1283_v60 = vmul.f32 %v3020_v62, %v1260_v51  ;;  %v1284_v63 = vmul.f32 %v3047_v61, %v1260_v51  ;;  %v2507_v62 = vld [vmem:[%s3453_s7 + $0x8] sm:$0xff]   ;;  %v2508_v61 = vld [vmem:[%s3453_s7] sm:$0xff]  }
 0x38e   : > { %v3148_v30 = vmul.f32 %v1359_v42, %v1281_v40  ;;  %v3150_v12 = vmul.f32 %v1363_v17, %v1282_v50  ;;  %2420 = vmatprep.subr.bf16.mxu1 %v2507_v62 }
 0x38f   : > { %v3156_v33 = vmul.f32 %v1370_v0, %v1283_v60  ;;  %2421 = vmatpush3.bf16.msra.mxu1 %v2507_v62 }
 0x390   : > { %2422 = vmatprep.subr.bf16.mxu1 %v2508_v61 }
 0x391   : > { %1436 = vperm.xlu0 %2495, %v3114_v25   ;;  %1439 = vperm.xlu1 %2494, %v3116_v52   ;;  %v1374_v1 = vpop.permute.xlu1 %1373 }
 0x392   : > { %v3158_v28 = vmul.f32 %v1374_v1, %v1284_v63 }
 0x393   : > { %2423 = vmatpush3.bf16.msra.mxu1 %v2508_v61 }
 0x395   : > { %1442 = vperm.xlu0 %2495, %v3126_v27   ;;  %1445 = vperm.xlu1 %2494, %v3122_v35  }
 0x396   : > { %2425 = vmatmul.mubr.msk.bf16.vlgmr.msra.gmra.mxu1 %vm511_vm0, %v2546_v45 }
 0x397   : > { %2428 = vmatprep.mubr.msk.bf16.mxu1 %vm511_vm0, %v2547_v2 }
 0x399   : > { %1448 = vperm.xlu0 %2495, %v3135_v37   ;;  %1451 = vperm.xlu1 %2494, %v3131_v49  }
 0x39d   : > { %1454 = vperm.xlu0 %2495, %v3140_v38   ;;  %1457 = vperm.xlu1 %2494, %v3142_v55  }
 0x39e   : > { %2429 = vmatmul.mubr.msk.bf16.gmra.mxu1 %vm511_vm0, %v2548_v44 }
 0x39f   : > { %2432 = vmatprep.mubr.msk.bf16.mxu1 %vm511_vm0, %v2549_v6 }
 0x3a1   : > { %1460 = vperm.xlu0 %2495, %v3148_v30   ;;  %1463 = vperm.xlu1 %2494, %v3150_v12  }
 0x3a5   : > { %1466 = vperm.xlu0 %2495, %v3156_v33   ;;  %1469 = vperm.xlu1 %2494, %v3158_v28  }
 0x3a6   : > { %2433 = vmatmul.mubr.msk.bf16.gmra.mxu1 %vm511_vm0, %v2749_v7 }
 0x3a7   : > { %2436 = vmatprep.mubr.msk.bf16.mxu1 %vm511_vm0, %v2752_v8 }
 0x3ae   : > { %2437 = vmatmul.mubr.msk.bf16.gmra.mxu1 %vm511_vm0, %v2759_v9 }
 0x404   : > { %v1425_v5 = vpop.permute.xlu0 %1424  ;;  %v1428_v47 = vpop.permute.xlu1 %1427 }
 0x405   : > { %v1474_v14 = vrot.slane %v1425_v5, %v2887_v56  ;;  %v1478_v48 = vrot.slane %v1428_v47, %v2882_v54 }
 0x407   : > { %v1479_v63 = vsel %vm904_vm2, %v1478_v48, %v1474_v14 }
 0x408   : > { %v1431_v13 = vpop.permute.xlu0 %1430  ;;  %v1434_v16 = vpop.permute.xlu1 %1433 }
 0x409   : > { %v1483_v22 = vrot.slane %v1431_v13, %v2887_v56  ;;  %v1487_v7 = vrot.slane %v1434_v16, %v2882_v54 }
 0x40b   : > { %v1488_v34 = vsel %vm904_vm2, %v1487_v7, %v1483_v22 }
 0x40c   : > { %v1437_v18 = vpop.permute.xlu0 %1436  ;;  %v1440_v53 = vpop.permute.xlu1 %1439  ;;  %v1543_v61 = vsel %vm969_vm3, %v1488_v34, %v1479_v63 }
 0x40d   : > { %v1492_v23 = vrot.slane %v1437_v18, %v2887_v56  ;;  %v1496_v8 = vrot.slane %v1440_v53, %v2882_v54 }
 0x40f   : > { %v1497_v40 = vsel %vm904_vm2, %v1496_v8, %v1492_v23 }
 0x410   : > { %v1443_v19 = vpop.permute.xlu0 %1442  ;;  %v1446_v41 = vpop.permute.xlu1 %1445  ;;  %v1544_v2 = vsel %vm971_vm4, %v1497_v40, %v1543_v61 }
 0x411   : > { %v1501_v42 = vrot.slane %v1443_v19, %v2887_v56  ;;  %v1505_v39 = vrot.slane %v1446_v41, %v2882_v54 }
 0x413   : > { %v1506_v0 = vsel %vm904_vm2, %v1505_v39, %v1501_v42 }
 0x414   : > { %v1449_v26 = vpop.permute.xlu0 %1448  ;;  %v1452_v29 = vpop.permute.xlu1 %1451  ;;  %v1545_v6 = vsel %vm973_vm5, %v1506_v0, %v1544_v2 }
 0x415   : > { %v1510_v31 = vrot.slane %v1449_v26, %v2887_v56  ;;  %v1514_v58 = vrot.slane %v1452_v29, %v2882_v54 }
 0x417   : > { %v1515_v45 = vsel %vm904_vm2, %v1514_v58, %v1510_v31 }
 0x418   : > { %v1455_v32 = vpop.permute.xlu0 %1454  ;;  %v1458_v9 = vpop.permute.xlu1 %1457  ;;  %v1546_v16 = vsel %vm975_vm6, %v1515_v45, %v1545_v6 }
 0x419   : > { %v1519_v17 = vrot.slane %v1455_v32, %v2887_v56  ;;  %v1523_v51 = vrot.slane %v1458_v9, %v2882_v54 }
 0x41b   : > { %v1524_v44 = vsel %vm904_vm2, %v1523_v51, %v1519_v17 }
 0x41c   : > { %v1461_v50 = vpop.permute.xlu0 %1460  ;;  %v1464_v60 = vpop.permute.xlu1 %1463  ;;  %v1547_v19 = vsel %vm977_vm7, %v1524_v44, %v1546_v16 }
 0x41d   : > { %v1528_v1 = vrot.slane %v1461_v50, %v2887_v56  ;;  %v1532_v62 = vrot.slane %v1464_v60, %v2882_v54 }
 0x41f   : > { %v1533_v5 = vsel %vm904_vm2, %v1532_v62, %v1528_v1  ;;  %v1876_v62 = vld [vmem:[%s427_s30] sm:$0xff]  ;;  %s419_s30 = scalar_lea.vmem [#allocation2], %s2334_s16  ;;  %s2554_s16 = sshll.u32 %s2616_s21, 4  ;;  %s2555_s16 = int_to_ptr.vmem [resolvable:$false] %s2554_s16 }
 0x420   : > { %v1467_v47 = vpop.permute.xlu0 %1466  ;;  %v1470_v13 = vpop.permute.xlu1 %1469  ;;  %v1548_v26 = vsel %vm979_vm8, %v1533_v5, %v1547_v19  ;;  %v1885_v45 = vrot.slane %v1876_v62, %v2775_v15  ;;  %v1878_v44 = vcombine.high %v1876_v62, %v1876_v62  ;;  %s2235_s29 = sshll.u32 %s419_s30, 4  ;;  %s2556_s25 = scalar_lea.vmem %s2555_s16, 256  ;;  %s2236_s29 = int_to_ptr.vmem [resolvable:$true] %s2235_s29 }
 0x421   : > { %v1537_v18 = vrot.slane %v1467_v47, %v2887_v56  ;;  %v1541_v53 = vrot.slane %v1470_v13, %v2882_v54  ;;  %s2550_s22 = scalar_lea.vmem %s2236_s29, 128  ;;  %p2557_p1 = scmp.lt.s32.totalorder %s2236_s29, %s2555_s16 }
 0x422   : > { %v1893_v6 = vcombine.high %v1885_v45, %v1885_v45  ;;  %v1901_v47 = vrot.slane %v1885_v45, %v2775_v15  ;;  %v1892_v16 = vrot.slane %v1878_v44, %v2775_v15  ;;  %p2551_p12 = scmp.ne.s32.totalorder %s2236_s29, %s2550_s22  ;;  %p2558_p2 = scmp.lt.s32.totalorder %s2556_s25, %s2550_s22 }
 0x423   : > { %v1542_v41 = vsel %vm904_vm2, %v1541_v53, %v1537_v18 }
 0x424   : > { %v1549_v29 = vsel %vm981_vm9, %v1542_v41, %v1548_v26  ;;  %v1915_v18 = vrot.slane %v1893_v6, %v2775_v15  ;;  %v1930_v19 = vrot.slane %v1901_v47, %v2780_v20  ;;  %p2552_p13 = pnand %p2551_p12, %p2715_p5  ;;  %p2559_p3 = por %p2558_p2, %p2557_p1 }
 0x425   : > { %v1551_v22 = vsel %vm984_vm10, %v1549_v29, 0.0  ;;  %v1894_v29 = vcombine.high %v1892_v16, %v1892_v16 }
 0x426   : > { %1552 = vadd.xlane.f32.xlu0 %v1551_v22  ;;  %v1934_v22 = vrot.slane %v1915_v18, %v2780_v20  ;;  %p2553_p0 = pneg %p2552_p13 }
 0x428   : > { %p2560_p4 = pnand %p2559_p3, %p2553_p0 }
 0x4af   : > { %v1553_v7 = vpop.xlane.xlu0 %1552 }
 0x4b0   : > { %v1554_v23 = vadd.f32 1e-08, %v1553_v7  ;;  %v3271_v7 = vld [vmem:[%s3449_s3 + $0x8] sm:$0xff] }
 0x4b2   : > { %2544 = vrcp.f32 %v1554_v23 }
 0x4bf   : > { %v2545_v8 = vpop.eup %2544 }
 0x4c0   : > { %v1556_v32 = vmul.f32 %v2545_v8, %v1554_v23  ;;  %v1923_v23 = vcombine.high %v1901_v47, %v1901_v47 }
 0x4c2   : > { %v1557_v9 = vsub.f32 2.0, %v1556_v32 }
 0x4c4   : > { %v1558_v14 = vmul.f32 %v2545_v8, %v1557_v9  ;;  %v1925_v9 = vcombine.high %v1915_v18, %v1915_v18 }
 0x4c6   : > { %v1579_v48 = vrot.slane %v1558_v14, %v2987_v21  ;;  %v1563_v42 = vrot.slane %v1558_v14, %v2780_v20  ;;  %v1591_v58 = vrot.slane %v1558_v14, %v2972_v46  ;;  %v1567_v51 = vrot.slane %v1558_v14, %v2950_v36 }
 0x4c8   : > { %v1608_v39 = vmul.f32 %v1579_v48, %v3135_v37  ;;  %v1600_v31 = vmul.f32 %v1563_v42, %v3095_v10  ;;  %v1615_v34 = vmul.f32 %v1591_v58, %v3158_v28  ;;  %v1601_v17 = vmul.f32 %v1563_v42, %v3097_v11 }
 0x4c9   : > { %v1602_v21 = vmul.f32 %v1567_v51, %v3104_v24  ;;  %v1603_v40 = vmul.f32 %v1567_v51, %v3106_v3  ;;  %v1571_v37 = vrot.slane %v1558_v14, %v2960_v57  ;;  %v1575_v28 = vrot.slane %v1558_v14, %v2978_v4 }
 0x4ca   : > { %1657 = vperm.xlu0 %2495, %v1608_v39   ;;  %1633 = vperm.xlu1 %2494, %v1600_v31   ;;  %v1609_v24 = vmul.f32 %v1579_v48, %v3131_v49  ;;  %v1583_v3 = vrot.slane %v1558_v14, %v2955_v43  ;;  %v1614_v49 = vmul.f32 %v1591_v58, %v3156_v33  ;;  %v3278_v48 = vld [vmem:[%s3449_s3] sm:$0xff] }
 0x4cb   : > { %v1604_v46 = vmul.f32 %v1571_v37, %v3114_v25  ;;  %v1605_v10 = vmul.f32 %v1571_v37, %v3116_v52  ;;  %v1606_v36 = vmul.f32 %v1575_v28, %v3126_v27  ;;  %v1607_v11 = vmul.f32 %v1575_v28, %v3122_v35  ;;  %v2124_v35 = vld [vmem:[%s3455_s9 + $0x18] sm:$0xff] }
 0x4cc   : > { %v1610_v57 = vmul.f32 %v1583_v3, %v3140_v38  ;;  %v1611_v25 = vmul.f32 %v1583_v3, %v3142_v55  ;;  %v1587_v52 = vrot.slane %v1558_v14, %v2964_v59  ;;  %v2614_v27 = vmov 0.0   ;;  %v2123_v59 = vld [vmem:[%s3455_s9 + $0x10] sm:$0xff]  ;;  %v2122_v38 = vld [vmem:[%s3455_s9 + $0x8] sm:$0xff]  ;;  %v2121_v55 = vld [vmem:[%s3455_s9] sm:$0xff] }
 0x4cd   : > { %2440 = vmatprep.subr.mxu0 %v2614_v27  ;;  %2448 = vmatprep.mubr.msk.f32.mxu0 %vm2615_vm11, %v2614_v27  ;;  %v1922_v31 = vrot.slane %v1894_v29, %v2775_v15  ;;  %v1908_v58 = vrot.slane %v1892_v16, %v2775_v15 }
 0x4ce   : > { %1678 = vperm.xlu0 %2495, %v1615_v34   ;;  %1636 = vperm.xlu1 %2494, %v1601_v17   ;;  %v1612_v4 = vmul.f32 %v1587_v52, %v3148_v30  ;;  %v1613_v43 = vmul.f32 %v1587_v52, %v3150_v12  ;;  %v2426_v30 = vpop.f32.mrf.mxu1  ;;  %v1938_v17 = vrot.slane %v1923_v23, %v2780_v20 }
 0x4cf   : > { %2441 = vmatpush3.msra.mxu0 %v2124_v35  ;;  %v1969_v34 = vadd.f32 %v2426_v30, %v1934_v22 }
 0x4d0   : > { %2442 = vmatprep.subr.mxu0 %v2614_v27  ;;  %v1813_v12 = vpop.f32.mrf.mxu1 }
 0x4d1   : > { %2443 = vmatpush3.msra.mxu0 %v2123_v59  ;;  %v1967_v32 = vadd.f32 %v1930_v19, %v1813_v12 }
 0x4d2   : > { %1639 = vperm.xlu1 %2494, %v1602_v21   ;;  %2444 = vmatprep.subr.mxu0 %v2614_v27  ;;  %v2427_v33 = vpop.f32.mrf.mxu1 }
 0x4d3   : > { %2445 = vmatpush3.msra.mxu0 %v2122_v38  ;;  %v1970_v42 = vadd.f32 %v2427_v33, %v1934_v22  ;;  %v1985_v21 = vadd.f32 %v3278_v48, %v1967_v32 }
 0x4d4   : > { %2446 = vmatprep.subr.mxu0 %v2614_v27  ;;  %v1816_v50 = vpop.f32.mrf.mxu1 }
 0x4d5   : > { %2447 = vmatpush3.msra.mxu0 %v2121_v55  ;;  %v1968_v26 = vadd.f32 %v1930_v19, %v1816_v50  ;;  %v1924_v55 = vcombine.high %v1908_v58, %v1908_v58 }
 0x4d6   : > { %1642 = vperm.xlu1 %2494, %v1603_v40   ;;  %v2430_v60 = vpop.f32.mrf.mxu1  ;;  %v1942_v40 = vrot.slane %v1925_v9, %v2780_v20 }
 0x4d7   : > { %v1986_v39 = vadd.f32 %v3271_v7, %v1968_v26  ;;  %v1954_v47 = vrot.slane %v1924_v55, %v2780_v20 }
 0x4d8   : > { %v1829_v63 = vpop.f32.mrf.mxu1  ;;  %v1973_v52 = vadd.f32 %v2430_v60, %v1942_v40 }
 0x4d9   : > { %v2002_v28 = vmax.f32 %v1986_v39, 0.0  ;;  %v1971_v15 = vadd.f32 %v1938_v17, %v1829_v63 }
 0x4da   : > { %1645 = vperm.xlu1 %2494, %v1604_v46   ;;  %v2431_v0 = vpop.f32.mrf.mxu1  ;;  %v1988_v46 = vadd.f32 %v3271_v7, %v1970_v42  ;;  %v1991_v63 = vadd.f32 %v3278_v48, %v1973_v52 }
 0x4db   : > { %v1974_v3 = vadd.f32 %v2431_v0, %v1942_v40  ;;  %v1989_v33 = vadd.f32 %v3278_v48, %v1971_v15 }
 0x4dc   : > { %v1832_v1 = vpop.f32.mrf.mxu1  ;;  %v2004_v27 = vmax.f32 %v1988_v46, 0.0  ;;  %v2007_v29 = vmax.f32 %v1991_v63, 0.0 }
 0x4dd   : > { %v1992_v50 = vadd.f32 %v3271_v7, %v1974_v3  ;;  %v2005_v19 = vmax.f32 %v1989_v33, 0.0 }
 0x4de   : > { %1648 = vperm.xlu1 %2494, %v1605_v10   ;;  %v2434_v61 = vpop.f32.mrf.mxu1  ;;  %v1972_v10 = vadd.f32 %v1938_v17, %v1832_v1 }
 0x4df   : > { %v2008_v26 = vmax.f32 %v1992_v50, 0.0 }
 0x4e0   : > { %v1845_v5 = vpop.f32.mrf.mxu1 }
 0x4e2   : > { %1651 = vperm.xlu1 %2494, %v1606_v36   ;;  %v3262_v53 = vpop.f32.mrf.mxu1  ;;  %v1946_v36 = vrot.slane %v1908_v58, %v2780_v20 }
 0x4e4   : > { %v1848_v8 = vpop.f32.mrf.mxu1  ;;  %v1975_v59 = vadd.f32 %v1946_v36, %v1845_v5 }
 0x4e6   : > { %1654 = vperm.xlu1 %2494, %v1607_v11   ;;  %v2438_v51 = vpop.f32.mrf.mxu1  ;;  %v1926_v11 = vcombine.high %v1922_v31, %v1922_v31  ;;  %v1993_v5 = vadd.f32 %v3278_v48, %v1975_v59 }
 0x4e8   : > { %v1958_v38 = vrot.slane %v1926_v11, %v2780_v20 }
 0x4ea   : > { %1660 = vperm.xlu1 %2494, %v1609_v24   ;;  %v1987_v24 = vadd.f32 %v3278_v48, %v1969_v34  ;;  %v2009_v34 = vmax.f32 %v1993_v5, 0.0  ;;  %v1981_v17 = vadd.f32 %v2438_v51, %v1958_v38 }
 0x4ec   : > { %v2003_v12 = vmax.f32 %v1987_v24, 0.0  ;;  %v3329_v52 = vadd.f32 %v3278_v48, %v1981_v17 }
 0x4ee   : > { %1663 = vperm.xlu1 %2494, %v1610_v57   ;;  %v1861_v57 = vpop.f32.mrf.mxu1 }
 0x4f0   : > { %v2439_v60 = vpop.f32.mrf.mxu1 }
 0x4f1   : > { %v1982_v16 = vadd.f32 %v2439_v60, %v1958_v38 }
 0x4f2   : > { %1666 = vperm.xlu1 %2494, %v1611_v25   ;;  %v2001_v25 = vmax.f32 %v1985_v21, 0.0  ;;  %v1864_v9 = vpop.f32.mrf.mxu1  ;;  %v1979_v21 = vadd.f32 %v1954_v47, %v1861_v57 }
 0x4f3   : > { %v2000_v40 = vadd.f32 %v3271_v7, %v1982_v16 }
 0x4f6   : > { %1669 = vperm.xlu1 %2494, %v1612_v4   ;;  %v1950_v4 = vrot.slane %v1922_v31, %v2780_v20 }
 0x4f8   : > { %v1977_v0 = vadd.f32 %v2434_v61, %v1950_v4  ;;  %v1978_v23 = vadd.f32 %v3262_v53, %v1950_v4 }
 0x4fa   : > { %1672 = vperm.xlu1 %2494, %v1613_v43   ;;  %v1990_v43 = vadd.f32 %v3271_v7, %v1972_v10  ;;  %v1995_v22 = vadd.f32 %v3278_v48, %v1977_v0 }
 0x4fc   : > { %v2006_v45 = vmax.f32 %v1990_v43, 0.0  ;;  %v1997_v43 = vadd.f32 %v3278_v48, %v1979_v21 }
 0x4fe   : > { %1675 = vperm.xlu1 %2494, %v1614_v49   ;;  %v1976_v49 = vadd.f32 %v1946_v36, %v1848_v8  ;;  %v1996_v36 = vadd.f32 %v3271_v7, %v1978_v23 }
 0x500   : > { %v1994_v44 = vadd.f32 %v3271_v7, %v1976_v49  ;;  %v2012_v60 = vmax.f32 %v1996_v36, 0.0 }
 0x502   : > { %v2010_v42 = vmax.f32 %v1994_v44, 0.0 }
 0x545   : > { %v3255_v2 = vpop.permute.xlu1 %1633  ;;  %v3314_v39 = vpop.permute.xlu0 %1657 }
 0x546   : > { %v2033_v1 = vmul.f32 %v2001_v25, %v3255_v2  ;;  %v2011_v25 = vmax.f32 %v1995_v22, 0.0  ;;  %v2041_v4 = vmul.f32 %v2009_v34, %v3314_v39  ;;  %v1719_v16 = vrot.slane %v3314_v39, %v2887_v56 }
 0x548   : > { %v2049_v8 = vsel %vm511_vm0, %v2033_v1, 0.0  ;;  %v2015_v1 = vmax.f32 %v3329_v52, 0.0  ;;  %v2085_v48 = vsel %vm511_vm0, %v2041_v4, 0.0 }
 0x549   : > { %v3258_v13 = vpop.permute.xlu1 %1636  ;;  %v3333_v49 = vpop.permute.xlu0 %1678 }
 0x54a   : > { %v2034_v30 = vmul.f32 %v2002_v28, %v3258_v13  ;;  %v1980_v28 = vadd.f32 %v1954_v47, %v1864_v9  ;;  %v1750_v9 = vrot.slane %v3333_v49, %v2882_v54 }
 0x54c   : > { %v2050_v18 = vsel %vm511_vm0, %v2034_v30, 0.0  ;;  %v1998_v55 = vadd.f32 %v3271_v7, %v1980_v28 }
 0x54d   : > { %v3265_v41 = vpop.permute.xlu1 %1639  ;;  %v2051_v20 = vadd.f32 %v2050_v18, %v2049_v8  ;;  %v1683_v18 = vrot.slane %v3255_v2, %v2887_v56 }
 0x54e   : > { %v2035_v61 = vmul.f32 %v2003_v12, %v3265_v41  ;;  %v2014_v7 = vmax.f32 %v1998_v55, 0.0 }
 0x54f   : > { %v2052_v15 = vrot.slane %v2051_v20, 4 }
 0x550   : > { %v2058_v53 = vsel %vm511_vm0, %v2035_v61, 0.0 }
 0x551   : > { %v3273_v14 = vpop.permute.xlu1 %1642  ;;  %v2053_v63 = vadd.f32 %v2052_v15, %v2051_v20  ;;  %v1692_v20 = vrot.slane %v3265_v41, %v2887_v56 }
 0x552   : > { %v2036_v6 = vmul.f32 %v2004_v27, %v3273_v14  ;;  %v2016_v27 = vmax.f32 %v2000_v40, 0.0  ;;  %v1696_v23 = vrot.slane %v3273_v14, %v2882_v54 }
 0x553   : > { %v2054_v22 = vrot.slane %v2053_v63, 2 }
 0x554   : > { %v2059_v31 = vsel %vm511_vm0, %v2036_v6, 0.0  ;;  %v2013_v6 = vmax.f32 %v1997_v43, 0.0 }
 0x555   : > { %v3286_v37 = vpop.permute.xlu1 %1645  ;;  %v2060_v11 = vadd.f32 %v2059_v31, %v2058_v53 }
 0x556   : > { %v2037_v46 = vmul.f32 %v2005_v19, %v3286_v37  ;;  %v1701_v14 = vrot.slane %v3286_v37, %v2887_v56 }
 0x557   : > { %v2061_v30 = vrot.slane %v2060_v11, 4 }
 0x558   : > { %v2067_v59 = vsel %vm511_vm0, %v2037_v46, 0.0  ;;  %v2055_v46 = vadd.f32 %v2054_v22, %v2053_v63 }
 0x559   : > { %v3292_v35 = vpop.permute.xlu1 %1648  ;;  %v2062_v19 = vadd.f32 %v2061_v30, %v2060_v11 }
 0x55a   : > { %v2038_v58 = vmul.f32 %v2006_v45, %v3292_v35  ;;  %v2048_v45 = vmul.f32 %v2016_v27, %v3333_v49  ;;  %v1705_v39 = vrot.slane %v3292_v35, %v2882_v54  ;;  %v1697_v35 = vsel %vm904_vm2, %v1696_v23, %v1692_v20 }
 0x55b   : > { %v2063_v34 = vrot.slane %v2062_v19, 2 }
 0x55c   : > { %v2068_v3 = vsel %vm511_vm0, %v2038_v58, 0.0 }
 0x55d   : > { %v3301_v62 = vpop.permute.xlu1 %1651  ;;  %v2069_v12 = vadd.f32 %v2068_v3, %v2067_v59 }
 0x55e   : > { %v2039_v51 = vmul.f32 %v2007_v29, %v3301_v62  ;;  %v1687_v29 = vrot.slane %v3258_v13, %v2882_v54  ;;  %v1710_v37 = vrot.slane %v3301_v62, %v2887_v56 }
 0x560   : > { %v2076_v0 = vsel %vm511_vm0, %v2039_v51, 0.0  ;;  %v1688_v53 = vsel %vm904_vm2, %v1687_v29, %v1683_v18 }
 0x561   : > { %v3312_v32 = vpop.permute.xlu1 %1654 }
 0x562   : > { %v2040_v10 = vmul.f32 %v2008_v26, %v3312_v32  ;;  %v2070_v26 = vrot.slane %v2069_v12, 4  ;;  %v1714_v41 = vrot.slane %v3312_v32, %v2882_v54 }
 0x564   : > { %v2077_v38 = vsel %vm511_vm0, %v2040_v10, 0.0  ;;  %v2071_v17 = vadd.f32 %v2070_v26, %v2069_v12  ;;  %v1706_v10 = vsel %vm904_vm2, %v1705_v39, %v1701_v14  ;;  %v1715_v43 = vsel %vm904_vm2, %v1714_v41, %v1710_v37 }
 0x565   : > { %v3323_v24 = vpop.permute.xlu1 %1660  ;;  %v2078_v44 = vadd.f32 %v2077_v38, %v2076_v0 }
 0x566   : > { %v2042_v57 = vmul.f32 %v2010_v42, %v3323_v24  ;;  %v2113_v42 = vsel %vm511_vm0, %v2048_v45, 0.0  ;;  %v1723_v36 = vrot.slane %v3323_v24, %v2882_v54  ;;  %v2072_v4 = vrot.slane %v2071_v17, 2 }
 0x567   : > { %v2079_v2 = vrot.slane %v2078_v44, 4 }
 0x568   : > { %v2086_v33 = vsel %vm511_vm0, %v2042_v57, 0.0  ;;  %v1752_v57 = vsel %vm969_vm3, %v1697_v35, %v1688_v53  ;;  %v1724_v55 = vsel %vm904_vm2, %v1723_v36, %v1719_v16 }
 0x569   : > { %v1664_v50 = vpop.permute.xlu1 %1663  ;;  %v2087_v5 = vadd.f32 %v2086_v33, %v2085_v48  ;;  %v2080_v28 = vadd.f32 %v2079_v2, %v2078_v44  ;;  %v1753_v38 = vsel %vm971_vm4, %v1706_v10, %v1752_v57  ;;  %v2073_v44 = vadd.f32 %v2072_v4, %v2071_v17 }
 0x56a   : > { %v2043_v47 = vmul.f32 %v2011_v25, %v1664_v50  ;;  %v2064_v25 = vadd.f32 %v2063_v34, %v2062_v19  ;;  %v1728_v49 = vrot.slane %v1664_v50, %v2887_v56  ;;  %v1754_v0 = vsel %vm973_vm5, %v1715_v43, %v1753_v38 }
 0x56b   : > { %v2088_v31 = vrot.slane %v2087_v5, 4  ;;  %v2081_v62 = vrot.slane %v2080_v28, 2  ;;  %v2074_v2 = vrot.slane %v2073_v44, 1 }
 0x56c   : > { %v2094_v13 = vsel %vm511_vm0, %v2043_v47, 0.0 }
 0x56d   : > { %v1667_v61 = vpop.permute.xlu1 %1666  ;;  %v2089_v15 = vadd.f32 %v2088_v31, %v2087_v5  ;;  %v2082_v16 = vadd.f32 %v2081_v62, %v2080_v28 }
 0x56e   : > { %v2044_v8 = vmul.f32 %v2012_v60, %v1667_v61  ;;  %v1732_v3 = vrot.slane %v1667_v61, %v2882_v54 }
 0x56f   : > { %v2090_v12 = vrot.slane %v2089_v15, 2  ;;  %v2083_v20 = vrot.slane %v2082_v16, 1 }
 0x570   : > { %v2095_v58 = vsel %vm511_vm0, %v2044_v8, 0.0  ;;  %v1733_v33 = vsel %vm904_vm2, %v1732_v3, %v1728_v49 }
 0x571   : > { %v2096_v21 = vadd.f32 %v2095_v58, %v2094_v13  ;;  %v1670_v40 = vpop.permute.xlu1 %1669  ;;  %v2091_v26 = vadd.f32 %v2090_v12, %v2089_v15  ;;  %v2084_v53 = vadd.f32 %v2083_v20, %v2082_v16 }
 0x572   : > { %v2045_v51 = vmul.f32 %v2013_v6, %v1670_v40  ;;  %v1737_v30 = vrot.slane %v1670_v40, %v2887_v56  ;;  %v1755_v6 = vsel %vm975_vm6, %v1724_v55, %v1754_v0 }
 0x573   : > { %v2097_v11 = vrot.slane %v2096_v21, 4  ;;  %v1756_v19 = vsel %vm977_vm7, %v1733_v33, %v1755_v6  ;;  %v2092_v58 = vrot.slane %v2091_v26, 1 }
 0x574   : > { %v2103_v60 = vsel %vm511_vm0, %v2045_v51, 0.0 }
 0x575   : > { %v2098_v27 = vadd.f32 %v2097_v11, %v2096_v21  ;;  %v1673_v32 = vpop.permute.xlu1 %1672  ;;  %v2075_v21 = vadd.f32 %v2074_v2, %v2073_v44  ;;  %v2093_v41 = vadd.f32 %v2092_v58, %v2091_v26 }
 0x576   : > { %v1741_v24 = vrot.slane %v1673_v32, %v2882_v54  ;;  %v2046_v59 = vmul.f32 %v2014_v7, %v1673_v32  ;;  %v2065_v7 = vrot.slane %v2064_v25, 1 }
 0x577   : > { %v2099_v50 = vrot.slane %v2098_v27, 2 }
 0x578   : > { %v2104_v63 = vsel %vm511_vm0, %v2046_v59, 0.0  ;;  %v1742_v54 = vsel %vm904_vm2, %v1741_v24, %v1737_v30  ;;  %v2066_v34 = vadd.f32 %v2065_v7, %v2064_v25 }
 0x579   : > { %v2105_v48 = vadd.f32 %v2104_v63, %v2103_v60  ;;  %v1676_v45 = vpop.permute.xlu1 %1675  ;;  %v1757_v22 = vsel %vm979_vm8, %v1742_v54, %v1756_v19  ;;  %v2100_v23 = vadd.f32 %v2099_v50, %v2098_v27  ;;  %v2369_v27 = vld [vmem:[%s3456_s10] ss:$0 sm:$0xff] }
 0x57a   : > { %v1746_v5 = vrot.slane %v1676_v45, %v2887_v56  ;;  %v2047_v47 = vmul.f32 %v2015_v1, %v1676_v45  ;;  %v2056_v1 = vrot.slane %v2055_v46, 1 }
 0x57b   : > { %v2106_v18 = vrot.slane %v2105_v48, 4  ;;  %v2101_v14 = vrot.slane %v2100_v23, 1 }
 0x57c   : > { %v2112_v61 = vsel %vm511_vm0, %v2047_v47, 0.0  ;;  %v1751_v29 = vsel %vm904_vm2, %v1750_v9, %v1746_v5  ;;  %v2057_v40 = vadd.f32 %v2056_v1, %v2055_v46 }
 0x57d   : > { %v2107_v8 = vadd.f32 %v2106_v18, %v2105_v48  ;;  %v2114_v39 = vadd.f32 %v2113_v42, %v2112_v61  ;;  %v1758_v56 = vsel %vm981_vm9, %v1751_v29, %v1757_v22  ;;  %v2102_v28 = vadd.f32 %v2101_v14, %v2100_v23 }
 0x57e   : > { %v1760_v52 = vsel %vm984_vm10, %v1758_v56, 0.0  ;;  %v2141_v10 = vsel %vm969_vm3, %v2066_v34, %v2057_v40 }
 0x57f   : > { %v2108_v31 = vrot.slane %v2107_v8, 2  ;;  %v2115_v13 = vrot.slane %v2114_v39, 4  ;;  %1761 = vadd.xlane.f32.xlu1 %v1760_v52  ;;  %v2142_v11 = vsel %vm971_vm4, %v2075_v21, %v2141_v10 }
 0x580   : > { %v2143_v15 = vsel %vm973_vm5, %v2084_v53, %v2142_v11 }
 0x581   : > { %v2109_v17 = vadd.f32 %v2108_v31, %v2107_v8  ;;  %v2116_v9 = vadd.f32 %v2115_v13, %v2114_v39  ;;  %v2144_v51 = vsel %vm975_vm6, %v2093_v41, %v2143_v15 }
 0x582   : > { %v2145_v46 = vsel %vm977_vm7, %v2102_v28, %v2144_v51 }
 0x583   : > { %v2110_v35 = vrot.slane %v2109_v17, 1  ;;  %v2117_v42 = vrot.slane %v2116_v9, 2 }
 0x585   : > { %v2118_v36 = vadd.f32 %v2117_v42, %v2116_v9  ;;  %v2111_v37 = vadd.f32 %v2110_v35, %v2109_v17 }
 0x587   : > { %v2119_v3 = vrot.slane %v2118_v36, 1  ;;  %v2146_v25 = vsel %vm979_vm8, %v2111_v37, %v2145_v46 }
 0x589   : > { %v2120_v57 = vadd.f32 %v2119_v3, %v2118_v36 }
 0x58b   : > { %v2147_v4 = vsel %vm981_vm9, %v2120_v57, %v2146_v25 }
 0x58c   : > { %2449 = vmatmul.mubr.msk.f32.vlgmr.msra.gmra.mxu0 %vm511_vm0, %v2147_v4 }
 0x608   : > { %v1762_v32 = vpop.xlane.xlu1 %1761 }
 0x609   : > { %v2132_v43 = vmul.f32 %v2369_v27, %v1762_v32 }
 0x64c   : > { %v2216_v49 = vpop.f32.mrf.mxu0 }
 0x64d   : > { %v2217_v24 = vadd.f32 %v2216_v49, %v2132_v43 }
 0x64e   : > { %v2450_v59 = vpop.f32.mrf.mxu0 }
 0x64f   : > { %2220 = vst.msk [vmem:[%s419_s30] sm:$0xff] %vm511_vm0, %v2217_v24 }
 0x650   : > { %2563 = shalt.err (!%p2560_p4)
}
 0x651   : > { %s2564_s24 = scalar_lea.hbm %s3410_s14, 128  ;;  %s2568_s12 = scalar_lea.hbm %s3457_s11, 256 }
 0x652   : > { %p2565_p7 = scmp.ne.s32.totalorder %s3410_s14, %s2564_s24  ;;  %p2569_p10 = scmp.lt.s32.totalorder %s3410_s14, %s3457_s11 }
 0x653   : > { %p2570_p11 = scmp.lt.s32.totalorder %s2568_s12, %s2564_s24 }
 0x654   : > { %p2566_p8 = pnand %p2565_p7, %p2715_p5 }
 0x655   : > { %p2571_p12 = por %p2570_p11, %p2569_p10 }
 0x656   : > { %p2567_p9 = pneg %p2566_p8 }
 0x658   : > { %p2572_p13 = pnand %p2571_p12, %p2567_p9 }
 0x65a   : > { %2575 = shalt.err (!%p2572_p13)
}
 0x65b   : > { %2451 = dma.vmem_to_hbm [thread:$0]  (%p2715_p5), %s2236_s29, 128, %s3410_s14, %s2222_s0  }
 0x65c PF: > { %p2457_p0 = scmp.ge.s32.totalorder %s2610_s20, 2  ;;  %s2247_s22 = sand.u32 1, %s2598_s17  }
 0x65d   : > { %s2248_s16 = scalar_lea.sflag [#allocation3], %s2247_s22 }
 0x65e   : > { %p2454_p1 = pnand %p2457_p0, %p2719_p6 }
 0x660   : > { %p2455_p2 = pneg %p2454_p1 }
 0x662   : > { %2593 = dma.done.wait (%p2455_p2), %s2248_s16, 128  }
 0x663   : > { %2595 = vsyncadd (%p2455_p2), %s2248_s16, 4294967168  ;;  %p21_p3 = scmp.ge.s32.totalorder %s2702_s23, 4   ;;  %s3462_s17 = smov %s2602_s18 }
 0x664   : > { %s3463_s18 = smov %s2606_s19  ;;  %s3464_s19 = smov %s2713_s26 }
 0x665   : > { %s3465_s20 = smov %s2702_s23  ;;  %23 = sbr.rel (!%p21_p3) target bundleno = 5 (0x5), region = 108 }
 0x66a   :  { %2253 = vsyncpa [#allocation3], 1 }
 0x66b   :  { %2255 = vsyncpa [#allocation3 + $0x1], 1 }

</bundles_post_ra>
